<compile_context>
chip_gen: v7x
topology: tpu7x:2x2x1
jax: 0.10.0
libtpu: 0.0.40
codegen_flags: <defaults>
</compile_context>

<pallas_src>
import jax
import jax.numpy as jnp
from jax.experimental import pallas as pl
from jax.experimental.pallas import tpu as pltpu


# ----------------------------- Pallas kernel ------------------------------

def _fused_attention_kernel(
    p2c_gid_ref,      # (Lp, 2*Ng*K + Ng, 1) int32  fused gather ids per p2c level
    p2c_sid_ref,      # (Lp, 1, Ng)          int32  scatter targets (parents[:, 0])
    p2c_mask_ref,     # (Lp, Ng, K)          f32    additive softmax mask
    c2p_gid_ref,      # (Lc, T*Nc + Nc, 1)   int32  fused gather ids per c2p level
    c2p_sid_ref,      # (Lc, 1, Nc)          int32  scatter targets (children[:, 0])
    w_emb_ref,        # (V, E)   f32  embedding table
    w_att_ref,        # (2E, A)  f32  W_attention (original, concatenated)
    b_att_ref,        # (1, A)   f32
    v_att_ref,        # (A, 1)   f32
    wih_ref,          # (E, 3E)  f32  GRU input weights, gate order (r, z, n)
    whh_ref,          # (E, 3E)  f32  GRU hidden weights, gate order (r, z, n)
    bih_ref,          # (1, 3E)  f32
    bhh_ref,          # (1, 3E)  f32
    out_ref,          # (V, E)   f32  updated embedding table (aliases w_emb)
):
    V, E = out_ref.shape
    Lp, Ng, K = p2c_mask_ref.shape
    Lc = c2p_gid_ref.shape[0]
    Nc = c2p_sid_ref.shape[2]
    T = (c2p_gid_ref.shape[1] - Nc) // Nc
    GK = Ng * K
    TN = T * Nc

    def gather_rows(ids_col, table):
        # Exact row gather as a single one-hot MXU matmul: (R, 1) ids -> (R, E).
        rows = ids_col.shape[0]
        cols = jax.lax.broadcasted_iota(jnp.int32, (rows, V), 1)
        onehot = (ids_col == cols).astype(jnp.float32)
        return jnp.dot(onehot, table, preferred_element_type=jnp.float32)

    def scatter_rows(table, ids_row, new_rows):
        # One-hot MXU scatter + single full-tile select.
        # TODO(synk): a matmul scatter sums duplicate target rows; ontology
        #         levels scatter to unique ids so this equals last-write-wins.
        rows = ids_row.shape[1]
        row_iota = jax.lax.broadcasted_iota(jnp.int32, (V, rows), 0)
        onehot = (row_iota == ids_row).astype(jnp.float32)              # (V, rows)
        scattered = jnp.dot(onehot, new_rows, preferred_element_type=jnp.float32)
        hit = jnp.sum(onehot, axis=1, keepdims=True) > 0.0              # (V, 1)
        return jnp.where(hit, scattered, table)

    # ---- hoisted parameter loads (not re-emitted per unrolled iteration) ----
    w_att = w_att_ref[...]
    b_att = b_att_ref[...]
    v_att = v_att_ref[...]

    # Table stays resident in VMEM/vregs for the whole kernel; written back once.
    table = w_emb_ref[...]

    # ---------------- parent -> children attention levels ------------------
    for lvl in range(Lp):
        g = gather_rows(p2c_gid_ref[lvl], table)           # (2*GK + Ng, E)
        par = g[:GK]                                       # per-slot parent rows
        chi = g[GK:2 * GK]                                 # child rows
        par0 = g[2 * GK:]                                  # parents[:, 0] rows (Ng, E)

        att_in = jnp.concatenate([par, chi], axis=1)       # (GK, 2E) lane concat
        tmp = jnp.dot(att_in, w_att, preferred_element_type=jnp.float32) + b_att
        mlp = jnp.maximum(tmp, 0.01 * tmp)                 # LeakyReLU(0.01)
        pre = jnp.dot(mlp, v_att, preferred_element_type=jnp.float32)   # (GK, 1)
        pre = pre.reshape(Ng, K) + p2c_mask_ref[lvl]

        # masked softmax over the K children slots
        m = jnp.max(pre, axis=1, keepdims=True)
        e = jnp.exp(pre - m)
        # approx=True rejected: later levels amplify the approx-rcp error.
        att = e * pl.reciprocal(jnp.sum(e, axis=1, keepdims=True), approx=False)

        temp = jnp.sum(chi.reshape(Ng, K, E) * att[:, :, None], axis=1)  # (Ng, E)
        new_emb = (temp + par0) * 0.5
        table = scatter_rows(table, p2c_sid_ref[lvl], new_emb)

    # ---------------- children -> parent GRU levels ------------------------
    # Hoisted GRU parameter loads.
    wih = wih_ref[...]
    whh = whh_ref[...]
    bih = bih_ref[...]
    bhh = bhh_ref[...]

    for lvl in range(Lc):
        g = gather_rows(c2p_gid_ref[lvl], table)           # (TN + Nc, E)
        x = g[:TN]                                         # time-major GRU inputs
        res = g[TN:]                                       # residual rows (Nc, E)

        # Input gates hoisted out of the recurrence: one wide MXU call.
        gi = jnp.dot(x, wih, preferred_element_type=jnp.float32) + bih  # (TN, 3E)
        h = jnp.zeros((Nc, E), jnp.float32)
        for t in range(T):                                 # static unroll (EUP overlap)
            gi_t = gi[t * Nc:(t + 1) * Nc, :]
            gh = jnp.dot(h, whh, preferred_element_type=jnp.float32) + bhh
            r = jax.nn.sigmoid(gi_t[:, :E] + gh[:, :E])
            z = jax.nn.sigmoid(gi_t[:, E:2 * E] + gh[:, E:2 * E])
            n = jnp.tanh(gi_t[:, 2 * E:] + r * gh[:, 2 * E:])
            h = (1.0 - z) * n + z * h
        out_rows = (h + res) * 0.5
        table = scatter_rows(table, c2p_sid_ref[lvl], out_rows)

    out_ref[...] = table


# ----------------------------- wrapper -------------------------------------

def attention_forward(W_emb, p2c_parent, p2c_children, p2c_mask,
                      c2p_parents, c2p_child, c2p_mask, params):
    """Functional equivalent of Attention.forward.  In torch, W_tmp aliases
    W_emb, so a single evolving table is threaded through all levels."""
    del c2p_mask  # unused by the reference forward
    W_att, b_att, v_att, wih, whh, bih, bhh = params
    V, E = W_emb.shape
    A = W_att.shape[1]
    Ng, K = p2c_parent[0].shape
    Nc, T = c2p_parents[0].shape
    GK = Ng * K
    i32 = jnp.int32

    # ---- index plumbing (tiny, done once outside the kernel) ----
    # fused p2c gather ids: [parents per slot | children per slot | parents[:,0]]
    p2c_gid = jnp.stack([
        jnp.concatenate([p.reshape(GK), c.reshape(GK), p[:, 0]]).astype(i32)[:, None]
        for p, c in zip(p2c_parent, p2c_children)])                     # (Lp, 2GK+Ng, 1)
    p2c_sid = jnp.stack([p[None, :, 0] for p in p2c_parent]).astype(i32)  # (Lp, 1, Ng)
    p2c_m = jnp.stack(p2c_mask).astype(jnp.float32)                       # (Lp, Ng, K)

    # fused c2p gather ids: [GRU inputs, time-major (row t*Nc+n <- parents[n,t])
    #                        | children[:, 0] residual rows]
    c2p_gid = jnp.stack([
        jnp.concatenate([p.T.reshape(T * Nc), c[:, 0]]).astype(i32)[:, None]
        for p, c in zip(c2p_parents, c2p_child)])                       # (Lc, TN+Nc, 1)
    c2p_sid = jnp.stack([c[None, :, 0] for c in c2p_child]).astype(i32)   # (Lc, 1, Nc)

    # ---- parameter repacking (done once) ----
    b2 = b_att.reshape(1, A)
    vc = v_att.reshape(A, 1)
    wih_c = jnp.concatenate([wih[0], wih[1], wih[2]], axis=1)   # (E, 3E), gates (r,z,n)
    whh_c = jnp.concatenate([whh[0], whh[1], whh[2]], axis=1)
    bih_c = jnp.concatenate([bih[0], bih[1], bih[2]], axis=1)   # (1, 3E)
    bhh_c = jnp.concatenate([bhh[0], bhh[1], bhh[2]], axis=1)

    return pl.pallas_call(
        _fused_attention_kernel,
        out_shape=jax.ShapeDtypeStruct((V, E), jnp.float32),
        in_specs=[pl.BlockSpec(memory_space=pltpu.MemorySpace.VMEM)
                  for _ in range(13)],
        out_specs=pl.BlockSpec(memory_space=pltpu.MemorySpace.VMEM),
        input_output_aliases={5: 0},   # W_emb input -> output table buffer
    )(p2c_gid, p2c_sid, p2c_m,
      c2p_gid, c2p_sid,
      W_emb, W_att, b2, vc,
      wih_c, whh_c, bih_c, bhh_c)


# ----------------------------- pure-JAX reference --------------------------

def _ref_forward(W_emb, p2c_parent, p2c_children, p2c_mask,
                 c2p_parents, c2p_child, c2p_mask, params):
    W_att, b_att, v_att, wih, whh, bih, bhh = params
    W_tmp = W_emb
    for parents, children, mask in zip(p2c_parent, p2c_children, p2c_mask):
        par = W_tmp[parents]
        chi = W_tmp[children]
        att_in = jnp.concatenate([par, chi], axis=2)
        tmp = att_in @ W_att + b_att
        mlp = jnp.where(tmp >= 0, tmp, 0.01 * tmp)
        pre = mlp @ v_att + mask
        att = jax.nn.softmax(pre, axis=1)
        temp = jnp.sum(chi * att[:, :, None], axis=1)
        new_emb = (temp + par[:, 0, :]) / 2
        W_tmp = W_tmp.at[parents[:, 0]].set(new_emb)

    for parents, children, _mask in zip(c2p_parents, c2p_child, c2p_mask):
        par = jnp.transpose(W_tmp[parents], (1, 0, 2))   # (T, N, E)
        chi = W_tmp[children]                            # (N, T, E)

        def step(h, x_t):
            r = jax.nn.sigmoid(x_t @ wih[0] + bih[0] + h @ whh[0] + bhh[0])
            z = jax.nn.sigmoid(x_t @ wih[1] + bih[1] + h @ whh[1] + bhh[1])
            n = jnp.tanh(x_t @ wih[2] + bih[2] + r * (h @ whh[2] + bhh[2]))
            return (1.0 - z) * n + z * h, None

        h0 = jnp.zeros((par.shape[1], par.shape[2]), jnp.float32)
        h_last, _ = jax.lax.scan(step, h0, par)
        out = (h_last + chi[:, 0, :]) / 2
        W_tmp = W_tmp.at[children[:, 0]].set(out)
    return W_tmp


# ----------------------------- main ----------------------------------------

if __name__ == "__main__":
    V, E, A = 40, 32, 16        # numNodes, embDimSize, attentionDimSize
    N, K, T = 8, 8, 4           # groups per level, children slots, GRU seq len

    key = jax.random.PRNGKey(0)
    keys = jax.random.split(key, 12)

    # embedding table input
    W_emb = jax.random.uniform(keys[0], (V, E), jnp.float32)

    # module parameters (deterministic, shapes from __init__)
    W_att = jax.random.uniform(keys[1], (2 * E, A), jnp.float32)   # torch.rand
    b_att = jnp.zeros((A,), jnp.float32)
    v_att = jax.random.uniform(keys[2], (A,), jnp.float32)
    kg = 1.0 / jnp.sqrt(jnp.float32(E))
    wih = jax.random.uniform(keys[3], (3, E, E), jnp.float32, -kg, kg)
    whh = jax.random.uniform(keys[4], (3, E, E), jnp.float32, -kg, kg)
    bih = jax.random.uniform(keys[5], (3, 1, E), jnp.float32, -kg, kg)
    bhh = jax.random.uniform(keys[6], (3, 1, E), jnp.float32, -kg, kg)
    params = (W_att, b_att, v_att, wih, whh, bih, bhh)

    # p2c levels (2 levels): parent id repeated over K slots, random children
    p2c_parent, p2c_children, p2c_mask = [], [], []
    for lvl, (kc, km, base) in enumerate([(keys[7], keys[8], 0),
                                          (keys[9], keys[10], 8)]):
        parents = jnp.tile(jnp.arange(base, base + N, dtype=jnp.int32)[:, None], (1, K))
        children = jax.random.randint(kc, (N, K), 0, V, jnp.int32)
        counts = jax.random.randint(km, (N,), 1, K + 1, jnp.int32)
        mask = jnp.where(jnp.arange(K)[None, :] < counts[:, None], 0.0, -1e9
                         ).astype(jnp.float32)
        p2c_parent.append(parents)
        p2c_children.append(children)
        p2c_mask.append(mask)

    # c2p level (1 level): paths of parent ids, unique child targets
    c2p_parents = [jax.random.randint(keys[11], (N, T), 0, V, jnp.int32)]
    c2p_child = [jnp.tile(jnp.arange(16, 16 + N, dtype=jnp.int32)[:, None], (1, T))]
    c2p_mask = [jnp.zeros((N, T), jnp.float32)]

    out = attention_forward(W_emb, p2c_parent, p2c_children, p2c_mask,
                            c2p_parents, c2p_child, c2p_mask, params)
    out = jax.block_until_ready(out)

    ref = jax.block_until_ready(
        _ref_forward(W_emb, p2c_parent, p2c_children, p2c_mask,
                     c2p_parents, c2p_child, c2p_mask, params))

    assert out.shape == (V, E) and out.dtype == jnp.float32
    max_err = float(jnp.max(jnp.abs(out - ref)))
    assert max_err < 1e-3, f"mismatch vs pure-JAX reference: {max_err}"
    print("KERNEL_OK")
</pallas_src>

<mosaic_0001>
module attributes {stable_mosaic.version = 11 : i64} {
  func.func @_fused_attention_kernel(%arg0: memref<2x136x1xi32, #tpu.memory_space<vmem>>, %arg1: memref<2x1x8xi32, #tpu.memory_space<vmem>>, %arg2: memref<2x8x8xf32, #tpu.memory_space<vmem>>, %arg3: memref<1x40x1xi32, #tpu.memory_space<vmem>>, %arg4: memref<1x1x8xi32, #tpu.memory_space<vmem>>, %arg5: memref<40x32xf32, #tpu.memory_space<vmem>>, %arg6: memref<64x16xf32, #tpu.memory_space<vmem>>, %arg7: memref<1x16xf32, #tpu.memory_space<vmem>>, %arg8: memref<16x1xf32, #tpu.memory_space<vmem>>, %arg9: memref<32x96xf32, #tpu.memory_space<vmem>>, %arg10: memref<32x96xf32, #tpu.memory_space<vmem>>, %arg11: memref<1x96xf32, #tpu.memory_space<vmem>>, %arg12: memref<1x96xf32, #tpu.memory_space<vmem>>, %arg13: memref<40x32xf32, #tpu.memory_space<vmem>>) attributes {dimension_semantics = [], scalar_prefetch = 0 : i64, scratch_operands = 0 : i64, tpu.core_type = #tpu.core_type<tc>} {
    %c0 = arith.constant 0 : index
    %c0_0 = arith.constant 0 : index
    %0 = vector.load %arg6[%c0, %c0_0] : memref<64x16xf32, #tpu.memory_space<vmem>>, vector<64x16xf32>
    %c0_1 = arith.constant 0 : index
    %c0_2 = arith.constant 0 : index
    %1 = vector.load %arg7[%c0_1, %c0_2] : memref<1x16xf32, #tpu.memory_space<vmem>>, vector<1x16xf32>
    %c0_3 = arith.constant 0 : index
    %c0_4 = arith.constant 0 : index
    %2 = vector.load %arg8[%c0_3, %c0_4] : memref<16x1xf32, #tpu.memory_space<vmem>>, vector<16x1xf32>
    %c0_5 = arith.constant 0 : index
    %c0_6 = arith.constant 0 : index
    %3 = vector.load %arg5[%c0_5, %c0_6] : memref<40x32xf32, #tpu.memory_space<vmem>>, vector<40x32xf32>
    %c0_7 = arith.constant 0 : index
    %c0_8 = arith.constant 0 : index
    %c0_9 = arith.constant 0 : index
    %4 = vector.load %arg0[%c0_7, %c0_8, %c0_9] : memref<2x136x1xi32, #tpu.memory_space<vmem>>, vector<1x136x1xi32>
    %5 = vector.shape_cast %4 : vector<1x136x1xi32> to vector<136x1xi32>
    %6 = tpu.iota {dimensions = array<i32: 1>} : vector<136x40xi32>
    %7 = vector.broadcast %5 : vector<136x1xi32> to vector<136x40xi32>
    %8 = arith.cmpi eq, %7, %6 : vector<136x40xi32>
    %9 = arith.extui %8 : vector<136x40xi1> to vector<136x40xi32>
    %10 = arith.sitofp %9 : vector<136x40xi32> to vector<136x40xf32>
    %cst = arith.constant dense<0.000000e+00> : vector<136x32xf32>
    %11 = tpu.matmul %10, %3, %cst {dimension_numbers = #tpu.dot_dimension_numbers<[1], [0], [0], [1], [0, 0, 1, 1], [], []>} : vector<136x40xf32>, vector<40x32xf32>, vector<136x32xf32> -> vector<136x32xf32>
    %12 = vector.extract_strided_slice %11 {offsets = [0, 0], sizes = [64, 32], strides = [1, 1]} : vector<136x32xf32> to vector<64x32xf32>
    %13 = vector.extract_strided_slice %11 {offsets = [64, 0], sizes = [64, 32], strides = [1, 1]} : vector<136x32xf32> to vector<64x32xf32>
    %14 = vector.extract_strided_slice %11 {offsets = [128, 0], sizes = [8, 32], strides = [1, 1]} : vector<136x32xf32> to vector<8x32xf32>
    %15 = tpu.concatenate %12, %13 in 1 : vector<64x32xf32>, vector<64x32xf32> -> vector<64x64xf32>
    %cst_10 = arith.constant dense<0.000000e+00> : vector<64x16xf32>
    %16 = tpu.matmul %15, %0, %cst_10 {dimension_numbers = #tpu.dot_dimension_numbers<[1], [0], [0], [1], [0, 0, 1, 1], [], []>} : vector<64x64xf32>, vector<64x16xf32>, vector<64x16xf32> -> vector<64x16xf32>
    %17 = vector.broadcast %1 : vector<1x16xf32> to vector<64x16xf32>
    %18 = arith.addf %16, %17 : vector<64x16xf32>
    %cst_11 = arith.constant 0.00999999977 : f32
    %19 = vector.broadcast %cst_11 : f32 to vector<64x16xf32>
    %20 = arith.mulf %19, %18 : vector<64x16xf32>
    %21 = arith.maximumf %18, %20 : vector<64x16xf32>
    %cst_12 = arith.constant dense<0.000000e+00> : vector<64x1xf32>
    %22 = tpu.matmul %21, %2, %cst_12 {dimension_numbers = #tpu.dot_dimension_numbers<[1], [0], [0], [1], [0, 0, 1, 1], [], []>} : vector<64x16xf32>, vector<16x1xf32>, vector<64x1xf32> -> vector<64x1xf32>
    %23 = vector.shape_cast %22 : vector<64x1xf32> to vector<8x8xf32>
    %c0_13 = arith.constant 0 : index
    %c0_14 = arith.constant 0 : index
    %c0_15 = arith.constant 0 : index
    %24 = vector.load %arg2[%c0_13, %c0_14, %c0_15] : memref<2x8x8xf32, #tpu.memory_space<vmem>>, vector<1x8x8xf32>
    %25 = vector.shape_cast %24 : vector<1x8x8xf32> to vector<8x8xf32>
    %26 = arith.addf %23, %25 : vector<8x8xf32>
    %cst_16 = arith.constant dense<0xFF800000> : vector<8xf32>
    %27 = vector.multi_reduction <maximumf>, %26, %cst_16 [1] : vector<8x8xf32> to vector<8xf32>
    %28 = vector.shape_cast %27 : vector<8xf32> to vector<8x1xf32>
    %29 = vector.broadcast %28 : vector<8x1xf32> to vector<8x8xf32>
    %30 = arith.subf %26, %29 : vector<8x8xf32>
    %31 = math.exp %30 : vector<8x8xf32>
    %cst_17 = arith.constant dense<0.000000e+00> : vector<8xf32>
    %32 = vector.multi_reduction <add>, %31, %cst_17 [1] : vector<8x8xf32> to vector<8xf32>
    %33 = vector.shape_cast %32 : vector<8xf32> to vector<8x1xf32>
    %34 = tpu.reciprocal %33 : vector<8x1xf32> -> vector<8x1xf32>
    %35 = vector.broadcast %34 : vector<8x1xf32> to vector<8x8xf32>
    %36 = arith.mulf %31, %35 : vector<8x8xf32>
    %37 = vector.shape_cast %13 : vector<64x32xf32> to vector<8x8x32xf32>
    %38 = vector.shape_cast %36 : vector<8x8xf32> to vector<8x8x1xf32>
    %39 = vector.broadcast %38 : vector<8x8x1xf32> to vector<8x8x32xf32>
    %40 = arith.mulf %37, %39 : vector<8x8x32xf32>
    %cst_18 = arith.constant dense<0.000000e+00> : vector<8x32xf32>
    %41 = vector.multi_reduction <add>, %40, %cst_18 [1] : vector<8x8x32xf32> to vector<8x32xf32>
    %42 = arith.addf %41, %14 : vector<8x32xf32>
    %cst_19 = arith.constant 5.000000e-01 : f32
    %43 = vector.broadcast %cst_19 : f32 to vector<8x32xf32>
    %44 = arith.mulf %42, %43 : vector<8x32xf32>
    %c0_20 = arith.constant 0 : index
    %c0_21 = arith.constant 0 : index
    %c0_22 = arith.constant 0 : index
    %45 = vector.load %arg1[%c0_20, %c0_21, %c0_22] : memref<2x1x8xi32, #tpu.memory_space<vmem>>, vector<1x1x8xi32>
    %46 = vector.shape_cast %45 : vector<1x1x8xi32> to vector<1x8xi32>
    %47 = tpu.iota {dimensions = array<i32: 0>} : vector<40x8xi32>
    %48 = vector.broadcast %46 : vector<1x8xi32> to vector<40x8xi32>
    %49 = arith.cmpi eq, %47, %48 : vector<40x8xi32>
    %50 = arith.extui %49 : vector<40x8xi1> to vector<40x8xi32>
    %51 = arith.sitofp %50 : vector<40x8xi32> to vector<40x8xf32>
    %cst_23 = arith.constant dense<0.000000e+00> : vector<40x32xf32>
    %52 = tpu.matmul %51, %44, %cst_23 {dimension_numbers = #tpu.dot_dimension_numbers<[1], [0], [0], [1], [0, 0, 1, 1], [], []>} : vector<40x8xf32>, vector<8x32xf32>, vector<40x32xf32> -> vector<40x32xf32>
    %cst_24 = arith.constant dense<0.000000e+00> : vector<40xf32>
    %53 = vector.multi_reduction <add>, %51, %cst_24 [1] : vector<40x8xf32> to vector<40xf32>
    %54 = vector.shape_cast %53 : vector<40xf32> to vector<40x1xf32>
    %cst_25 = arith.constant 0.000000e+00 : f32
    %55 = vector.broadcast %cst_25 : f32 to vector<40x1xf32>
    %56 = arith.cmpf ogt, %54, %55 : vector<40x1xf32>
    %57 = vector.shape_cast %56 : vector<40x1xi1> to vector<40x1xi1>
    %58 = vector.broadcast %57 : vector<40x1xi1> to vector<40x32xi1>
    %59 = arith.select %58, %52, %3 : vector<40x32xi1>, vector<40x32xf32>
    %c1 = arith.constant 1 : index
    %c0_26 = arith.constant 0 : index
    %c0_27 = arith.constant 0 : index
    %60 = vector.load %arg0[%c1, %c0_26, %c0_27] : memref<2x136x1xi32, #tpu.memory_space<vmem>>, vector<1x136x1xi32>
    %61 = vector.shape_cast %60 : vector<1x136x1xi32> to vector<136x1xi32>
    %62 = tpu.iota {dimensions = array<i32: 1>} : vector<136x40xi32>
    %63 = vector.broadcast %61 : vector<136x1xi32> to vector<136x40xi32>
    %64 = arith.cmpi eq, %63, %62 : vector<136x40xi32>
    %65 = arith.extui %64 : vector<136x40xi1> to vector<136x40xi32>
    %66 = arith.sitofp %65 : vector<136x40xi32> to vector<136x40xf32>
    %cst_28 = arith.constant dense<0.000000e+00> : vector<136x32xf32>
    %67 = tpu.matmul %66, %59, %cst_28 {dimension_numbers = #tpu.dot_dimension_numbers<[1], [0], [0], [1], [0, 0, 1, 1], [], []>} : vector<136x40xf32>, vector<40x32xf32>, vector<136x32xf32> -> vector<136x32xf32>
    %68 = vector.extract_strided_slice %67 {offsets = [0, 0], sizes = [64, 32], strides = [1, 1]} : vector<136x32xf32> to vector<64x32xf32>
    %69 = vector.extract_strided_slice %67 {offsets = [64, 0], sizes = [64, 32], strides = [1, 1]} : vector<136x32xf32> to vector<64x32xf32>
    %70 = vector.extract_strided_slice %67 {offsets = [128, 0], sizes = [8, 32], strides = [1, 1]} : vector<136x32xf32> to vector<8x32xf32>
    %71 = tpu.concatenate %68, %69 in 1 : vector<64x32xf32>, vector<64x32xf32> -> vector<64x64xf32>
    %cst_29 = arith.constant dense<0.000000e+00> : vector<64x16xf32>
    %72 = tpu.matmul %71, %0, %cst_29 {dimension_numbers = #tpu.dot_dimension_numbers<[1], [0], [0], [1], [0, 0, 1, 1], [], []>} : vector<64x64xf32>, vector<64x16xf32>, vector<64x16xf32> -> vector<64x16xf32>
    %73 = vector.broadcast %1 : vector<1x16xf32> to vector<64x16xf32>
    %74 = arith.addf %72, %73 : vector<64x16xf32>
    %cst_30 = arith.constant 0.00999999977 : f32
    %75 = vector.broadcast %cst_30 : f32 to vector<64x16xf32>
    %76 = arith.mulf %75, %74 : vector<64x16xf32>
    %77 = arith.maximumf %74, %76 : vector<64x16xf32>
    %cst_31 = arith.constant dense<0.000000e+00> : vector<64x1xf32>
    %78 = tpu.matmul %77, %2, %cst_31 {dimension_numbers = #tpu.dot_dimension_numbers<[1], [0], [0], [1], [0, 0, 1, 1], [], []>} : vector<64x16xf32>, vector<16x1xf32>, vector<64x1xf32> -> vector<64x1xf32>
    %79 = vector.shape_cast %78 : vector<64x1xf32> to vector<8x8xf32>
    %c1_32 = arith.constant 1 : index
    %c0_33 = arith.constant 0 : index
    %c0_34 = arith.constant 0 : index
    %80 = vector.load %arg2[%c1_32, %c0_33, %c0_34] : memref<2x8x8xf32, #tpu.memory_space<vmem>>, vector<1x8x8xf32>
    %81 = vector.shape_cast %80 : vector<1x8x8xf32> to vector<8x8xf32>
    %82 = arith.addf %79, %81 : vector<8x8xf32>
    %cst_35 = arith.constant dense<0xFF800000> : vector<8xf32>
    %83 = vector.multi_reduction <maximumf>, %82, %cst_35 [1] : vector<8x8xf32> to vector<8xf32>
    %84 = vector.shape_cast %83 : vector<8xf32> to vector<8x1xf32>
    %85 = vector.broadcast %84 : vector<8x1xf32> to vector<8x8xf32>
    %86 = arith.subf %82, %85 : vector<8x8xf32>
    %87 = math.exp %86 : vector<8x8xf32>
    %cst_36 = arith.constant dense<0.000000e+00> : vector<8xf32>
    %88 = vector.multi_reduction <add>, %87, %cst_36 [1] : vector<8x8xf32> to vector<8xf32>
    %89 = vector.shape_cast %88 : vector<8xf32> to vector<8x1xf32>
    %90 = tpu.reciprocal %89 : vector<8x1xf32> -> vector<8x1xf32>
    %91 = vector.broadcast %90 : vector<8x1xf32> to vector<8x8xf32>
    %92 = arith.mulf %87, %91 : vector<8x8xf32>
    %93 = vector.shape_cast %69 : vector<64x32xf32> to vector<8x8x32xf32>
    %94 = vector.shape_cast %92 : vector<8x8xf32> to vector<8x8x1xf32>
    %95 = vector.broadcast %94 : vector<8x8x1xf32> to vector<8x8x32xf32>
    %96 = arith.mulf %93, %95 : vector<8x8x32xf32>
    %cst_37 = arith.constant dense<0.000000e+00> : vector<8x32xf32>
    %97 = vector.multi_reduction <add>, %96, %cst_37 [1] : vector<8x8x32xf32> to vector<8x32xf32>
    %98 = arith.addf %97, %70 : vector<8x32xf32>
    %cst_38 = arith.constant 5.000000e-01 : f32
    %99 = vector.broadcast %cst_38 : f32 to vector<8x32xf32>
    %100 = arith.mulf %98, %99 : vector<8x32xf32>
    %c1_39 = arith.constant 1 : index
    %c0_40 = arith.constant 0 : index
    %c0_41 = arith.constant 0 : index
    %101 = vector.load %arg1[%c1_39, %c0_40, %c0_41] : memref<2x1x8xi32, #tpu.memory_space<vmem>>, vector<1x1x8xi32>
    %102 = vector.shape_cast %101 : vector<1x1x8xi32> to vector<1x8xi32>
    %103 = tpu.iota {dimensions = array<i32: 0>} : vector<40x8xi32>
    %104 = vector.broadcast %102 : vector<1x8xi32> to vector<40x8xi32>
    %105 = arith.cmpi eq, %103, %104 : vector<40x8xi32>
    %106 = arith.extui %105 : vector<40x8xi1> to vector<40x8xi32>
    %107 = arith.sitofp %106 : vector<40x8xi32> to vector<40x8xf32>
    %cst_42 = arith.constant dense<0.000000e+00> : vector<40x32xf32>
    %108 = tpu.matmul %107, %100, %cst_42 {dimension_numbers = #tpu.dot_dimension_numbers<[1], [0], [0], [1], [0, 0, 1, 1], [], []>} : vector<40x8xf32>, vector<8x32xf32>, vector<40x32xf32> -> vector<40x32xf32>
    %cst_43 = arith.constant dense<0.000000e+00> : vector<40xf32>
    %109 = vector.multi_reduction <add>, %107, %cst_43 [1] : vector<40x8xf32> to vector<40xf32>
    %110 = vector.shape_cast %109 : vector<40xf32> to vector<40x1xf32>
    %cst_44 = arith.constant 0.000000e+00 : f32
    %111 = vector.broadcast %cst_44 : f32 to vector<40x1xf32>
    %112 = arith.cmpf ogt, %110, %111 : vector<40x1xf32>
    %113 = vector.shape_cast %112 : vector<40x1xi1> to vector<40x1xi1>
    %114 = vector.broadcast %113 : vector<40x1xi1> to vector<40x32xi1>
    %115 = arith.select %114, %108, %59 : vector<40x32xi1>, vector<40x32xf32>
    %c0_45 = arith.constant 0 : index
    %c0_46 = arith.constant 0 : index
    %116 = vector.load %arg9[%c0_45, %c0_46] : memref<32x96xf32, #tpu.memory_space<vmem>>, vector<32x96xf32>
    %c0_47 = arith.constant 0 : index
    %c0_48 = arith.constant 0 : index
    %117 = vector.load %arg10[%c0_47, %c0_48] : memref<32x96xf32, #tpu.memory_space<vmem>>, vector<32x96xf32>
    %c0_49 = arith.constant 0 : index
    %c0_50 = arith.constant 0 : index
    %118 = vector.load %arg11[%c0_49, %c0_50] : memref<1x96xf32, #tpu.memory_space<vmem>>, vector<1x96xf32>
    %c0_51 = arith.constant 0 : index
    %c0_52 = arith.constant 0 : index
    %119 = vector.load %arg12[%c0_51, %c0_52] : memref<1x96xf32, #tpu.memory_space<vmem>>, vector<1x96xf32>
    %c0_53 = arith.constant 0 : index
    %c0_54 = arith.constant 0 : index
    %c0_55 = arith.constant 0 : index
    %120 = vector.load %arg3[%c0_53, %c0_54, %c0_55] : memref<1x40x1xi32, #tpu.memory_space<vmem>>, vector<1x40x1xi32>
    %121 = vector.shape_cast %120 : vector<1x40x1xi32> to vector<40x1xi32>
    %122 = tpu.iota {dimensions = array<i32: 1>} : vector<40x40xi32>
    %123 = vector.broadcast %121 : vector<40x1xi32> to vector<40x40xi32>
    %124 = arith.cmpi eq, %123, %122 : vector<40x40xi32>
    %125 = arith.extui %124 : vector<40x40xi1> to vector<40x40xi32>
    %126 = arith.sitofp %125 : vector<40x40xi32> to vector<40x40xf32>
    %cst_56 = arith.constant dense<0.000000e+00> : vector<40x32xf32>
    %127 = tpu.matmul %126, %115, %cst_56 {dimension_numbers = #tpu.dot_dimension_numbers<[1], [0], [0], [1], [0, 0, 1, 1], [], []>} : vector<40x40xf32>, vector<40x32xf32>, vector<40x32xf32> -> vector<40x32xf32>
    %128 = vector.extract_strided_slice %127 {offsets = [0, 0], sizes = [32, 32], strides = [1, 1]} : vector<40x32xf32> to vector<32x32xf32>
    %129 = vector.extract_strided_slice %127 {offsets = [32, 0], sizes = [8, 32], strides = [1, 1]} : vector<40x32xf32> to vector<8x32xf32>
    %cst_57 = arith.constant dense<0.000000e+00> : vector<32x96xf32>
    %130 = tpu.matmul %128, %116, %cst_57 {dimension_numbers = #tpu.dot_dimension_numbers<[1], [0], [0], [1], [0, 0, 1, 1], [], []>} : vector<32x32xf32>, vector<32x96xf32>, vector<32x96xf32> -> vector<32x96xf32>
    %131 = vector.broadcast %118 : vector<1x96xf32> to vector<32x96xf32>
    %132 = arith.addf %130, %131 : vector<32x96xf32>
    %cst_58 = arith.constant 0.000000e+00 : f32
    %133 = vector.broadcast %cst_58 : f32 to vector<8x32xf32>
    %134 = vector.extract_strided_slice %132 {offsets = [0, 0], sizes = [8, 96], strides = [1, 1]} : vector<32x96xf32> to vector<8x96xf32>
    %cst_59 = arith.constant dense<0.000000e+00> : vector<8x96xf32>
    %135 = tpu.matmul %133, %117, %cst_59 {dimension_numbers = #tpu.dot_dimension_numbers<[1], [0], [0], [1], [0, 0, 1, 1], [], []>} : vector<8x32xf32>, vector<32x96xf32>, vector<8x96xf32> -> vector<8x96xf32>
    %136 = vector.broadcast %119 : vector<1x96xf32> to vector<8x96xf32>
    %137 = arith.addf %135, %136 : vector<8x96xf32>
    %138 = vector.extract_strided_slice %134 {offsets = [0, 0], sizes = [8, 32], strides = [1, 1]} : vector<8x96xf32> to vector<8x32xf32>
    %139 = vector.extract_strided_slice %137 {offsets = [0, 0], sizes = [8, 32], strides = [1, 1]} : vector<8x96xf32> to vector<8x32xf32>
    %140 = arith.addf %138, %139 : vector<8x32xf32>
    %141 = arith.negf %140 : vector<8x32xf32>
    %142 = math.exp %141 : vector<8x32xf32>
    %cst_60 = arith.constant 1.000000e+00 : f32
    %143 = vector.broadcast %cst_60 : f32 to vector<8x32xf32>
    %144 = arith.addf %143, %142 : vector<8x32xf32>
    %145 = arith.divf %143, %144 : vector<8x32xf32>
    %146 = vector.extract_strided_slice %134 {offsets = [0, 32], sizes = [8, 32], strides = [1, 1]} : vector<8x96xf32> to vector<8x32xf32>
    %147 = vector.extract_strided_slice %137 {offsets = [0, 32], sizes = [8, 32], strides = [1, 1]} : vector<8x96xf32> to vector<8x32xf32>
    %148 = arith.addf %146, %147 : vector<8x32xf32>
    %149 = arith.negf %148 : vector<8x32xf32>
    %150 = math.exp %149 : vector<8x32xf32>
    %cst_61 = arith.constant 1.000000e+00 : f32
    %151 = vector.broadcast %cst_61 : f32 to vector<8x32xf32>
    %152 = arith.addf %151, %150 : vector<8x32xf32>
    %153 = arith.divf %151, %152 : vector<8x32xf32>
    %154 = vector.extract_strided_slice %134 {offsets = [0, 64], sizes = [8, 32], strides = [1, 1]} : vector<8x96xf32> to vector<8x32xf32>
    %155 = vector.extract_strided_slice %137 {offsets = [0, 64], sizes = [8, 32], strides = [1, 1]} : vector<8x96xf32> to vector<8x32xf32>
    %156 = arith.mulf %145, %155 : vector<8x32xf32>
    %157 = arith.addf %154, %156 : vector<8x32xf32>
    %158 = math.tanh %157 : vector<8x32xf32>
    %cst_62 = arith.constant 1.000000e+00 : f32
    %159 = vector.broadcast %cst_62 : f32 to vector<8x32xf32>
    %160 = arith.subf %159, %153 : vector<8x32xf32>
    %161 = arith.mulf %160, %158 : vector<8x32xf32>
    %162 = arith.mulf %153, %133 : vector<8x32xf32>
    %163 = arith.addf %161, %162 : vector<8x32xf32>
    %164 = vector.extract_strided_slice %132 {offsets = [8, 0], sizes = [8, 96], strides = [1, 1]} : vector<32x96xf32> to vector<8x96xf32>
    %cst_63 = arith.constant dense<0.000000e+00> : vector<8x96xf32>
    %165 = tpu.matmul %163, %117, %cst_63 {dimension_numbers = #tpu.dot_dimension_numbers<[1], [0], [0], [1], [0, 0, 1, 1], [], []>} : vector<8x32xf32>, vector<32x96xf32>, vector<8x96xf32> -> vector<8x96xf32>
    %166 = vector.broadcast %119 : vector<1x96xf32> to vector<8x96xf32>
    %167 = arith.addf %165, %166 : vector<8x96xf32>
    %168 = vector.extract_strided_slice %164 {offsets = [0, 0], sizes = [8, 32], strides = [1, 1]} : vector<8x96xf32> to vector<8x32xf32>
    %169 = vector.extract_strided_slice %167 {offsets = [0, 0], sizes = [8, 32], strides = [1, 1]} : vector<8x96xf32> to vector<8x32xf32>
    %170 = arith.addf %168, %169 : vector<8x32xf32>
    %171 = arith.negf %170 : vector<8x32xf32>
    %172 = math.exp %171 : vector<8x32xf32>
    %cst_64 = arith.constant 1.000000e+00 : f32
    %173 = vector.broadcast %cst_64 : f32 to vector<8x32xf32>
    %174 = arith.addf %173, %172 : vector<8x32xf32>
    %175 = arith.divf %173, %174 : vector<8x32xf32>
    %176 = vector.extract_strided_slice %164 {offsets = [0, 32], sizes = [8, 32], strides = [1, 1]} : vector<8x96xf32> to vector<8x32xf32>
    %177 = vector.extract_strided_slice %167 {offsets = [0, 32], sizes = [8, 32], strides = [1, 1]} : vector<8x96xf32> to vector<8x32xf32>
    %178 = arith.addf %176, %177 : vector<8x32xf32>
    %179 = arith.negf %178 : vector<8x32xf32>
    %180 = math.exp %179 : vector<8x32xf32>
    %cst_65 = arith.constant 1.000000e+00 : f32
    %181 = vector.broadcast %cst_65 : f32 to vector<8x32xf32>
    %182 = arith.addf %181, %180 : vector<8x32xf32>
    %183 = arith.divf %181, %182 : vector<8x32xf32>
    %184 = vector.extract_strided_slice %164 {offsets = [0, 64], sizes = [8, 32], strides = [1, 1]} : vector<8x96xf32> to vector<8x32xf32>
    %185 = vector.extract_strided_slice %167 {offsets = [0, 64], sizes = [8, 32], strides = [1, 1]} : vector<8x96xf32> to vector<8x32xf32>
    %186 = arith.mulf %175, %185 : vector<8x32xf32>
    %187 = arith.addf %184, %186 : vector<8x32xf32>
    %188 = math.tanh %187 : vector<8x32xf32>
    %cst_66 = arith.constant 1.000000e+00 : f32
    %189 = vector.broadcast %cst_66 : f32 to vector<8x32xf32>
    %190 = arith.subf %189, %183 : vector<8x32xf32>
    %191 = arith.mulf %190, %188 : vector<8x32xf32>
    %192 = arith.mulf %183, %163 : vector<8x32xf32>
    %193 = arith.addf %191, %192 : vector<8x32xf32>
    %194 = vector.extract_strided_slice %132 {offsets = [16, 0], sizes = [8, 96], strides = [1, 1]} : vector<32x96xf32> to vector<8x96xf32>
    %cst_67 = arith.constant dense<0.000000e+00> : vector<8x96xf32>
    %195 = tpu.matmul %193, %117, %cst_67 {dimension_numbers = #tpu.dot_dimension_numbers<[1], [0], [0], [1], [0, 0, 1, 1], [], []>} : vector<8x32xf32>, vector<32x96xf32>, vector<8x96xf32> -> vector<8x96xf32>
    %196 = vector.broadcast %119 : vector<1x96xf32> to vector<8x96xf32>
    %197 = arith.addf %195, %196 : vector<8x96xf32>
    %198 = vector.extract_strided_slice %194 {offsets = [0, 0], sizes = [8, 32], strides = [1, 1]} : vector<8x96xf32> to vector<8x32xf32>
    %199 = vector.extract_strided_slice %197 {offsets = [0, 0], sizes = [8, 32], strides = [1, 1]} : vector<8x96xf32> to vector<8x32xf32>
    %200 = arith.addf %198, %199 : vector<8x32xf32>
    %201 = arith.negf %200 : vector<8x32xf32>
    %202 = math.exp %201 : vector<8x32xf32>
    %cst_68 = arith.constant 1.000000e+00 : f32
    %203 = vector.broadcast %cst_68 : f32 to vector<8x32xf32>
    %204 = arith.addf %203, %202 : vector<8x32xf32>
    %205 = arith.divf %203, %204 : vector<8x32xf32>
    %206 = vector.extract_strided_slice %194 {offsets = [0, 32], sizes = [8, 32], strides = [1, 1]} : vector<8x96xf32> to vector<8x32xf32>
    %207 = vector.extract_strided_slice %197 {offsets = [0, 32], sizes = [8, 32], strides = [1, 1]} : vector<8x96xf32> to vector<8x32xf32>
    %208 = arith.addf %206, %207 : vector<8x32xf32>
    %209 = arith.negf %208 : vector<8x32xf32>
    %210 = math.exp %209 : vector<8x32xf32>
    %cst_69 = arith.constant 1.000000e+00 : f32
    %211 = vector.broadcast %cst_69 : f32 to vector<8x32xf32>
    %212 = arith.addf %211, %210 : vector<8x32xf32>
    %213 = arith.divf %211, %212 : vector<8x32xf32>
    %214 = vector.extract_strided_slice %194 {offsets = [0, 64], sizes = [8, 32], strides = [1, 1]} : vector<8x96xf32> to vector<8x32xf32>
    %215 = vector.extract_strided_slice %197 {offsets = [0, 64], sizes = [8, 32], strides = [1, 1]} : vector<8x96xf32> to vector<8x32xf32>
    %216 = arith.mulf %205, %215 : vector<8x32xf32>
    %217 = arith.addf %214, %216 : vector<8x32xf32>
    %218 = math.tanh %217 : vector<8x32xf32>
    %cst_70 = arith.constant 1.000000e+00 : f32
    %219 = vector.broadcast %cst_70 : f32 to vector<8x32xf32>
    %220 = arith.subf %219, %213 : vector<8x32xf32>
    %221 = arith.mulf %220, %218 : vector<8x32xf32>
    %222 = arith.mulf %213, %193 : vector<8x32xf32>
    %223 = arith.addf %221, %222 : vector<8x32xf32>
    %224 = vector.extract_strided_slice %132 {offsets = [24, 0], sizes = [8, 96], strides = [1, 1]} : vector<32x96xf32> to vector<8x96xf32>
    %cst_71 = arith.constant dense<0.000000e+00> : vector<8x96xf32>
    %225 = tpu.matmul %223, %117, %cst_71 {dimension_numbers = #tpu.dot_dimension_numbers<[1], [0], [0], [1], [0, 0, 1, 1], [], []>} : vector<8x32xf32>, vector<32x96xf32>, vector<8x96xf32> -> vector<8x96xf32>
    %226 = vector.broadcast %119 : vector<1x96xf32> to vector<8x96xf32>
    %227 = arith.addf %225, %226 : vector<8x96xf32>
    %228 = vector.extract_strided_slice %224 {offsets = [0, 0], sizes = [8, 32], strides = [1, 1]} : vector<8x96xf32> to vector<8x32xf32>
    %229 = vector.extract_strided_slice %227 {offsets = [0, 0], sizes = [8, 32], strides = [1, 1]} : vector<8x96xf32> to vector<8x32xf32>
    %230 = arith.addf %228, %229 : vector<8x32xf32>
    %231 = arith.negf %230 : vector<8x32xf32>
    %232 = math.exp %231 : vector<8x32xf32>
    %cst_72 = arith.constant 1.000000e+00 : f32
    %233 = vector.broadcast %cst_72 : f32 to vector<8x32xf32>
    %234 = arith.addf %233, %232 : vector<8x32xf32>
    %235 = arith.divf %233, %234 : vector<8x32xf32>
    %236 = vector.extract_strided_slice %224 {offsets = [0, 32], sizes = [8, 32], strides = [1, 1]} : vector<8x96xf32> to vector<8x32xf32>
    %237 = vector.extract_strided_slice %227 {offsets = [0, 32], sizes = [8, 32], strides = [1, 1]} : vector<8x96xf32> to vector<8x32xf32>
    %238 = arith.addf %236, %237 : vector<8x32xf32>
    %239 = arith.negf %238 : vector<8x32xf32>
    %240 = math.exp %239 : vector<8x32xf32>
    %cst_73 = arith.constant 1.000000e+00 : f32
    %241 = vector.broadcast %cst_73 : f32 to vector<8x32xf32>
    %242 = arith.addf %241, %240 : vector<8x32xf32>
    %243 = arith.divf %241, %242 : vector<8x32xf32>
    %244 = vector.extract_strided_slice %224 {offsets = [0, 64], sizes = [8, 32], strides = [1, 1]} : vector<8x96xf32> to vector<8x32xf32>
    %245 = vector.extract_strided_slice %227 {offsets = [0, 64], sizes = [8, 32], strides = [1, 1]} : vector<8x96xf32> to vector<8x32xf32>
    %246 = arith.mulf %235, %245 : vector<8x32xf32>
    %247 = arith.addf %244, %246 : vector<8x32xf32>
    %248 = math.tanh %247 : vector<8x32xf32>
    %cst_74 = arith.constant 1.000000e+00 : f32
    %249 = vector.broadcast %cst_74 : f32 to vector<8x32xf32>
    %250 = arith.subf %249, %243 : vector<8x32xf32>
    %251 = arith.mulf %250, %248 : vector<8x32xf32>
    %252 = arith.mulf %243, %223 : vector<8x32xf32>
    %253 = arith.addf %251, %252 : vector<8x32xf32>
    %254 = arith.addf %253, %129 : vector<8x32xf32>
    %cst_75 = arith.constant 5.000000e-01 : f32
    %255 = vector.broadcast %cst_75 : f32 to vector<8x32xf32>
    %256 = arith.mulf %254, %255 : vector<8x32xf32>
    %c0_76 = arith.constant 0 : index
    %c0_77 = arith.constant 0 : index
    %c0_78 = arith.constant 0 : index
    %257 = vector.load %arg4[%c0_76, %c0_77, %c0_78] : memref<1x1x8xi32, #tpu.memory_space<vmem>>, vector<1x1x8xi32>
    %258 = vector.shape_cast %257 : vector<1x1x8xi32> to vector<1x8xi32>
    %259 = tpu.iota {dimensions = array<i32: 0>} : vector<40x8xi32>
    %260 = vector.broadcast %258 : vector<1x8xi32> to vector<40x8xi32>
    %261 = arith.cmpi eq, %259, %260 : vector<40x8xi32>
    %262 = arith.extui %261 : vector<40x8xi1> to vector<40x8xi32>
    %263 = arith.sitofp %262 : vector<40x8xi32> to vector<40x8xf32>
    %cst_79 = arith.constant dense<0.000000e+00> : vector<40x32xf32>
    %264 = tpu.matmul %263, %256, %cst_79 {dimension_numbers = #tpu.dot_dimension_numbers<[1], [0], [0], [1], [0, 0, 1, 1], [], []>} : vector<40x8xf32>, vector<8x32xf32>, vector<40x32xf32> -> vector<40x32xf32>
    %cst_80 = arith.constant dense<0.000000e+00> : vector<40xf32>
    %265 = vector.multi_reduction <add>, %263, %cst_80 [1] : vector<40x8xf32> to vector<40xf32>
    %266 = vector.shape_cast %265 : vector<40xf32> to vector<40x1xf32>
    %cst_81 = arith.constant 0.000000e+00 : f32
    %267 = vector.broadcast %cst_81 : f32 to vector<40x1xf32>
    %268 = arith.cmpf ogt, %266, %267 : vector<40x1xf32>
    %269 = vector.shape_cast %268 : vector<40x1xi1> to vector<40x1xi1>
    %270 = vector.broadcast %269 : vector<40x1xi1> to vector<40x32xi1>
    %271 = arith.select %270, %264, %115 : vector<40x32xi1>, vector<40x32xf32>
    %c0_82 = arith.constant 0 : index
    %c0_83 = arith.constant 0 : index
    %272 = vector.load %arg13[%c0_82, %c0_83] : memref<40x32xf32, #tpu.memory_space<vmem>>, vector<40x32xf32>
    tpu.vector_store %arg13[%c0_82, %c0_83], %271 {strides = array<i32>} : memref<40x32xf32, #tpu.memory_space<vmem>>, vector<40x32xf32>,
    return
  }
}

</mosaic_0001>

<bundles_post_ra>
// kernel: tpu_custom_call.1
= control target key start
LH: loop header
LB: loop body
LE: loop exit
PB: predicated region body
PF: predicated region fallthrough
CT: control target
= control target key end

     0   :  { %v4350_v0 = vmov 0   ;;  %v4351_v5 = vmov 0.0|0.0   ;;  %vm4352_vm0 = vmmov 0   ;;  %v4353_v6 = vmov 0.0   ;;  %s4354_s15 = smov 32   ;;  %s5532_s0 = inlined_call_operand.vmem [shape: s32[2,136,1], index: 0, kind: input, shape index: {}]   ;;  %s5533_s5 = inlined_call_operand.vmem [shape: f32[40,32], index: 5, kind: input, shape index: {}, may-alias: {5,13}]   ;;  %s5534_s6 = inlined_call_operand.vmem [shape: f32[64,16], index: 6, kind: input, shape index: {}]   ;;  %s5535_s8 = inlined_call_operand.vmem [shape: f32[16,1], index: 8, kind: input, shape index: {}]   ;;  %s5536_s2 = inlined_call_operand.vmem [shape: f32[2,8,8], index: 2, kind: input, shape index: {}]   ;;  %s5537_s7 = inlined_call_operand.vmem [shape: f32[1,16], index: 7, kind: input, shape index: {}]   ;;  %s5538_s1 = inlined_call_operand.vmem [shape: s32[2,1,8], index: 1, kind: input, shape index: {}]   ;;  %s5539_s3 = inlined_call_operand.vmem [shape: s32[1,40,1], index: 3, kind: input, shape index: {}]   ;;  %s5540_s10 = inlined_call_operand.vmem [shape: f32[32,96], index: 10, kind: input, shape index: {}]   ;;  %s5541_s9 = inlined_call_operand.vmem [shape: f32[32,96], index: 9, kind: input, shape index: {}]   ;;  %s5542_s12 = inlined_call_operand.vmem [shape: f32[1,96], index: 12, kind: input, shape index: {}]   ;;  %s5543_s11 = inlined_call_operand.vmem [shape: f32[1,96], index: 11, kind: input, shape index: {}]   ;;  %s5544_s4 = inlined_call_operand.vmem [shape: s32[1,1,8], index: 4, kind: input, shape index: {}]   ;;  %s5545_s13 = inlined_call_operand.vmem [shape: f32[40,32], index: 13, kind: output, shape index: {}, may-alias: {5,13}]  }
   0x1   :  { %4283 = vset.pattern.permute.xlu1 %v4350_v0  ;;  %4282 = vset.pattern.permute.xlu0 %v4350_v0  ;;  %v62_v1 = vld [vmem:[%s5532_s0 + $0x10] sm:$0xff]  ;;  %v60_v2 = vld [vmem:[%s5532_s0] sm:$0xff]  ;;  %v63_v3 = vld [vmem:[%s5532_s0 + $0x18] sm:$0xff]  ;;  %v77_v26 = vlaneseq  ;;  %vm181_vm1 = vcmask 326656  }
   0x2   :  { %86 = vperm.xlu1 %4283, %v62_v1   ;;  %80 = vperm.xlu0 %4282, %v60_v2   ;;  %v61_v4 = vld [vmem:[%s5532_s0 + $0x8] sm:$0xff]  ;;  %v55_v8 = vld [vmem:[%s5533_s5] sm:$0xff]  ;;  %v57_v12 = vld [vmem:[%s5533_s5 + $0x10] sm:$0xff] }
   0x3   :  { %4185 = vmatprep.subr.bf16.mxu0 %v4351_v5  ;;  %3851 = vmatprep.mubr.msk.f32.mxu0 %vm4352_vm0, %v4353_v6  ;;  %v65_v7 = vld [vmem:[%s5532_s0 + $0x28] sm:$0xff]  ;;  %v64_v10 = vld [vmem:[%s5532_s0 + $0x20] sm:$0xff]  ;;  %v58_v13 = vld [vmem:[%s5533_s5 + $0x18] sm:$0xff]  ;;  %v4496_v27 = vand.u32 127, %v77_v26 }
   0x4   :  { %v56_v9 = vld [vmem:[%s5533_s5 + $0x8] sm:$0xff]  ;;  %v4189_v14 = vpack.c.bf16 %v58_v13, %v57_v12  ;;  %v67_v15 = vld [vmem:[%s5532_s0 + $0x38] sm:$0xff]  ;;  %v66_v16 = vld [vmem:[%s5532_s0 + $0x30] sm:$0xff] }
   0x5   :  { %v4186_v11 = vpack.c.bf16 %v56_v9, %v55_v8  ;;  %v59_v17 = vld [vmem:[%s5533_s5 + $0x20] sm:$0xff]  ;;  %v69_v18 = vld [vmem:[%s5532_s0 + $0x48] sm:$0xff]  ;;  %v71_v20 = vld [vmem:[%s5532_s0 + $0x58] sm:$0xff] }
   0x6   :  { %89 = vperm.xlu1 %4283, %v63_v3   ;;  %83 = vperm.xlu0 %4282, %v61_v4   ;;  %v68_v19 = vld [vmem:[%s5532_s0 + $0x40] sm:$0xff]  ;;  %v70_v21 = vld [vmem:[%s5532_s0 + $0x50] sm:$0xff]  ;;  %v73_v22 = vld [vmem:[%s5532_s0 + $0x68] sm:$0xff] }
   0x7   :  { %4187 = vmatpush3.bf16.msra.mxu0 %v4186_v11  ;;  %v72_v23 = vld [vmem:[%s5532_s0 + $0x60] sm:$0xff]  ;;  %v75_v24 = vld [vmem:[%s5532_s0 + $0x78] sm:$0xff]  ;;  %v74_v25 = vld [vmem:[%s5532_s0 + $0x70] sm:$0xff] }
   0x8   :  { %4188 = vmatprep.subr.bf16.mxu0 %v4351_v5  ;;  %v44_v60 = vld [vmem:[%s5534_s6] sm:$0xff]  ;;  %v45_v61 = vld [vmem:[%s5534_s6 + $0x8] sm:$0xff]  ;;  %v46_v62 = vld [vmem:[%s5534_s6 + $0x10] sm:$0xff] }
   0x9   :  { %v4191_v63 = vpack.c.bf16 %v45_v61, %v44_v60  ;;  %v47_v0 = vld [vmem:[%s5534_s6 + $0x18] sm:$0xff]  ;;  %v48_v2 = vld [vmem:[%s5534_s6 + $0x20] sm:$0xff]  ;;  %v49_v3 = vld [vmem:[%s5534_s6 + $0x28] sm:$0xff] }
   0xa   :  { %95 = vperm.xlu1 %4283, %v65_v7   ;;  %92 = vperm.xlu0 %4282, %v64_v10   ;;  %v4195_v1 = vpack.c.bf16 %v47_v0, %v46_v62  ;;  %v4199_v4 = vpack.c.bf16 %v49_v3, %v48_v2  ;;  %v53_v60 = vld [vmem:[%s5535_s8] sm:$0xff]  ;;  %v54_v61 = vld [vmem:[%s5535_s8 + $0x8] sm:$0xff]  ;;  %s4355_s8 = smov 64  }
   0xb   :  { %4190 = vmatpush3.bf16.msra.mxu0 %v4189_v14  ;;  %4192 = vmatprep.subr.bf16.mxu1 %v4191_v63  ;;  %v4656_v62 = vpack.c.bf16 %v54_v61, %v53_v60  ;;  %v706_v0 = vld [vmem:[%s5536_s2] sm:$0xff] }
   0xc   :  { %3849 = vmatprep.subr.mxu0 %v4353_v6  ;;  %4194 = vmatpush3.bf16.msra.mxu1 %v4191_v63 }
   0xd   :  { %4196 = vmatprep.subr.bf16.mxu1 %v4195_v1 }
   0xe   :  { %101 = vperm.xlu1 %4283, %v67_v15   ;;  %98 = vperm.xlu0 %4282, %v66_v16  }
   0xf   :  { %3850 = vmatpush3.msra.mxu0 %v59_v17  ;;  %v50_v17 = vld [vmem:[%s5534_s6 + $0x30] sm:$0xff] }
  0x10   :  { %4218 = vmatprep.subr.bf16.mxu0 %v4191_v63  ;;  %4198 = vmatpush3.bf16.msra.mxu1 %v4195_v1 }
  0x11   :  { %4200 = vmatprep.subr.bf16.mxu1 %v4199_v4 }
  0x12   :  { %107 = vperm.xlu1 %4283, %v69_v18   ;;  %104 = vperm.xlu0 %4282, %v68_v19   ;;  %v51_v18 = vld [vmem:[%s5534_s6 + $0x38] sm:$0xff] }
  0x13   :  { %v4203_v19 = vpack.c.bf16 %v51_v18, %v50_v17  ;;  %v3547_v18 = vld [vmem:[%s5537_s7] ss:$0 sm:$0xff] }
  0x14   :  { %4202 = vmatpush3.bf16.msra.mxu1 %v4199_v4 }
  0x15   :  { %4204 = vmatprep.subr.bf16.mxu1 %v4203_v19 }
  0x16   :  { %113 = vperm.xlu1 %4283, %v71_v20   ;;  %110 = vperm.xlu0 %4282, %v70_v21  }
  0x18   :  { %4206 = vmatpush3.bf16.msra.mxu1 %v4203_v19 }
  0x19   :  { %4208 = vmatprep.subr.bf16.mxu1 %v4656_v62 }
  0x1a   :  { %119 = vperm.xlu1 %4283, %v73_v22   ;;  %116 = vperm.xlu0 %4282, %v72_v23  }
  0x1e   :  { %125 = vperm.xlu1 %4283, %v75_v24   ;;  %122 = vperm.xlu0 %4282, %v74_v25  }
  0x81   :  { %v81_v28 = vpop.permute.xlu0 %80  ;;  %v87_v30 = vpop.permute.xlu1 %86 }
  0x82   :  { %vm130_vm2 = vcmp.eq.s32.totalorder %v81_v28, %v4496_v27  ;;  %vm132_vm3 = vcmp.eq.s32.totalorder %v87_v30, %v4496_v27 }
  0x83   :  { %v3513_v29 = vsel %vm130_vm2, 1.0, %v4353_v6  ;;  %v3515_v33 = vsel %vm132_vm3, 1.0, %v4353_v6 }
  0x84   :  { %3852 = vmatmul.mubr.msk.f32.vlgmr.msra.gmra.mrb[0].mxu0 %vm181_vm1, %v3513_v29 }
  0x85   :  { %v84_v31 = vpop.permute.xlu0 %83  ;;  %3854 = vmatprep.mubr.msk.f32.mxu0 %vm4352_vm0, %v4353_v6  ;;  %v90_v34 = vpop.permute.xlu1 %89  ;;  %4220 = vmatpush3.bf16.msra.mxu0 %v4191_v63  ;;  %v4663_v63 = vshrl.u32 %v77_v26, 7 }
  0x86   :  { %vm131_vm4 = vcmp.eq.s32.totalorder %v84_v31, %v4496_v27  ;;  %vm133_vm5 = vcmp.eq.s32.totalorder %v90_v34, %v4496_v27  ;;  %4222 = vmatprep.subr.bf16.mxu0 %v4195_v1 }
  0x87   :  { %v3514_v32 = vsel %vm131_vm4, 1.0, %v4353_v6  ;;  %v3516_v36 = vsel %vm133_vm5, 1.0, %v4353_v6  ;;  %vm415_vm4 = vcmask 261120   ;;  %vm430_vm5 = vcmask 523264  }
  0x88   :  { %3855 = vmatmul.mubr.msk.f32.gmra.mrb[2].mxu0 %vm181_vm1, %v3514_v32  ;;  %v4672_v2 = vsub.s32 0, %v4663_v63  ;;  %v4675_v3 = vsub.s32 3, %v4663_v63 }
  0x89   :  { %3857 = vmatprep.mubr.msk.f32.mxu0 %vm4352_vm0, %v4353_v6  ;;  %v93_v35 = vpop.permute.xlu0 %92  ;;  %v96_v37 = vpop.permute.xlu1 %95  ;;  %4224 = vmatpush3.bf16.msra.mxu0 %v4195_v1  ;;  %v4669_v1 = vsub.s32 1, %v4663_v63 }
  0x8a   :  { %vm134_vm6 = vcmp.eq.s32.totalorder %v93_v35, %v4496_v27  ;;  %vm135_vm7 = vcmp.eq.s32.totalorder %v96_v37, %v4496_v27  ;;  %4226 = vmatprep.subr.bf16.mxu0 %v4199_v4  ;;  %v711_v26 = vrot.slane %v706_v0, %v4672_v2 }
  0x8b   :  { %v3517_v38 = vsel %vm134_vm6, 1.0, %v4353_v6  ;;  %v3518_v40 = vsel %vm135_vm7, 1.0, %v4353_v6  ;;  %vm576_vm6 = vcmask 130048   ;;  %vm844_vm7 = vcmask 1041409  }
  0x8c   :  { %3858 = vmatmul.mubr.msk.f32.gmra.mrb[4].mxu0 %vm181_vm1, %v3515_v33 }
  0x8d   :  { %3860 = vmatprep.mubr.msk.f32.mxu0 %vm4352_vm0, %v4353_v6  ;;  %v99_v39 = vpop.permute.xlu0 %98  ;;  %v102_v41 = vpop.permute.xlu1 %101  ;;  %4228 = vmatpush3.bf16.msra.mxu0 %v4199_v4  ;;  %v4678_v4 = vsub.s32 2, %v4663_v63 }
  0x8e   :  { %vm136_vm8 = vcmp.eq.s32.totalorder %v99_v39, %v4496_v27  ;;  %vm137_vm9 = vcmp.eq.s32.totalorder %v102_v41, %v4496_v27  ;;  %4230 = vmatprep.subr.bf16.mxu0 %v4203_v19 }
  0x8f   :  { %v3519_v42 = vsel %vm136_vm8, 1.0, %v4353_v6  ;;  %v3520_v44 = vsel %vm137_vm9, 1.0, %v4353_v6  ;;  %vm846_vm8 = vcmask 1042434   ;;  %vm848_vm9 = vcmask 1043459  }
  0x90   :  { %3861 = vmatmul.mubr.msk.f32.gmra.mrb[6].mxu0 %vm181_vm1, %v3516_v36 }
  0x91   :  { %3863 = vmatprep.mubr.msk.f32.mxu0 %vm4352_vm0, %v4353_v6  ;;  %v105_v43 = vpop.permute.xlu0 %104  ;;  %v108_v45 = vpop.permute.xlu1 %107  ;;  %4232 = vmatpush3.bf16.msra.mxu0 %v4203_v19 }
  0x92   :  { %vm138_vm10 = vcmp.eq.s32.totalorder %v105_v43, %v4496_v27  ;;  %vm139_vm11 = vcmp.eq.s32.totalorder %v108_v45, %v4496_v27  ;;  %4234 = vmatprep.subr.bf16.mxu0 %v4656_v62 }
  0x93   :  { %v3521_v46 = vsel %vm138_vm10, 1.0, %v4353_v6  ;;  %v3522_v48 = vsel %vm139_vm11, 1.0, %v4353_v6  ;;  %vm850_vm10 = vcmask 1044484   ;;  %vm852_vm11 = vcmask 1045509  }
  0x94   :  { %3864 = vmatmul.mubr.msk.f32.gmra.mrb[8].mxu0 %vm181_vm1, %v3517_v38 }
  0x95   :  { %3866 = vmatprep.mubr.msk.f32.mxu0 %vm4352_vm0, %v4353_v6  ;;  %v111_v47 = vpop.permute.xlu0 %110  ;;  %v114_v49 = vpop.permute.xlu1 %113 }
  0x96   :  { %vm140_vm12 = vcmp.eq.s32.totalorder %v111_v47, %v4496_v27  ;;  %vm141_vm13 = vcmp.eq.s32.totalorder %v114_v49, %v4496_v27 }
  0x97   :  { %v3523_v50 = vsel %vm140_vm12, 1.0, %v4353_v6  ;;  %v3524_v52 = vsel %vm141_vm13, 1.0, %v4353_v6  ;;  %vm854_vm12 = vcmask 1046534   ;;  %vm856_vm13 = vcmask 1047559  }
  0x98   :  { %3867 = vmatmul.mubr.msk.f32.gmra.mrb[10].mxu0 %vm181_vm1, %v3518_v40 }
  0x99   :  { %3869 = vmatprep.mubr.msk.f32.mxu0 %vm4352_vm0, %v4353_v6  ;;  %v117_v51 = vpop.permute.xlu0 %116  ;;  %v120_v53 = vpop.permute.xlu1 %119 }
  0x9a   :  { %vm142_vm14 = vcmp.eq.s32.totalorder %v117_v51, %v4496_v27  ;;  %vm143_vm15 = vcmp.eq.s32.totalorder %v120_v53, %v4496_v27 }
  0x9b   :  { %v3525_v54 = vsel %vm142_vm14, 1.0, %v4353_v6  ;;  %v3526_v56 = vsel %vm143_vm15, 1.0, %v4353_v6  ;;  %vm5546_vm14 = vcmask 64512  }
  0x9c   :  { %3870 = vmatmul.mubr.msk.f32.gmra.mrb[12].mxu0 %vm181_vm1, %v3519_v42 }
  0x9d   :  { %3872 = vmatprep.mubr.msk.f32.mxu0 %vm4352_vm0, %v4353_v6  ;;  %v123_v55 = vpop.permute.xlu0 %122  ;;  %v126_v57 = vpop.permute.xlu1 %125 }
  0x9e   :  { %vm144_vm2 = vcmp.eq.s32.totalorder %v123_v55, %v4496_v27  ;;  %vm145_vm3 = vcmp.eq.s32.totalorder %v126_v57, %v4496_v27 }
  0x9f   :  { %v3527_v58 = vsel %vm144_vm2, 1.0, %v4353_v6  ;;  %v3528_v59 = vsel %vm145_vm3, 1.0, %v4353_v6 }
  0xa0   :  { %3873 = vmatmul.mubr.msk.f32.gmra.mrb[14].mxu0 %vm181_vm1, %v3520_v44 }
  0xa1   :  { %3875 = vmatprep.mubr.msk.f32.mxu0 %vm4352_vm0, %v4353_v6 }
  0xa4   :  { %3876 = vmatmul.mubr.msk.f32.gmra.mrb[16].mxu0 %vm181_vm1, %v3521_v46 }
  0xa5   :  { %3878 = vmatprep.mubr.msk.f32.mxu0 %vm4352_vm0, %v4353_v6 }
  0xa8   :  { %3879 = vmatmul.mubr.msk.f32.gmra.mrb[18].mxu0 %vm181_vm1, %v3522_v48 }
  0xa9   :  { %3881 = vmatprep.mubr.msk.f32.mxu0 %vm4352_vm0, %v4353_v6 }
  0xac   :  { %3882 = vmatmul.mubr.msk.f32.gmra.mrb[20].mxu0 %vm181_vm1, %v3523_v50 }
  0xad   :  { %3884 = vmatprep.mubr.msk.f32.mxu0 %vm4352_vm0, %v4353_v6 }
  0xb0   :  { %3885 = vmatmul.mubr.msk.f32.gmra.mrb[22].mxu0 %vm181_vm1, %v3524_v52 }
  0xb1   :  { %3887 = vmatprep.mubr.msk.f32.mxu0 %vm4352_vm0, %v4353_v6 }
  0xb4   :  { %3888 = vmatmul.mubr.msk.f32.gmra.mrb[24].mxu0 %vm181_vm1, %v3525_v54 }
  0xb5   :  { %3890 = vmatprep.mubr.msk.f32.mxu0 %vm4352_vm0, %v4353_v6 }
  0xb8   :  { %3891 = vmatmul.mubr.msk.f32.gmra.mrb[26].mxu0 %vm181_vm1, %v3526_v56 }
  0xb9   :  { %3893 = vmatprep.mubr.msk.f32.mxu0 %vm4352_vm0, %v4353_v6 }
  0xbc   :  { %3894 = vmatmul.mubr.msk.f32.gmra.mrb[28].mxu0 %vm181_vm1, %v3527_v58 }
  0xbd   :  { %3896 = vmatprep.mubr.msk.f32.mxu0 %vm4352_vm0, %v4353_v6 }
  0xc0   :  { %3897 = vmatmul.mubr.msk.f32.gmra.mrb[30].mxu0 %vm181_vm1, %v3528_v59 }
  0xc1   :  { %3899 = vmatprep.mubr.msk.f32.mxu0 %vm4352_vm0, %v4353_v6 }
 0x157   :  { %v299_v7 = vpop.f32.mrb[0].mxu0 }
 0x158   :  { %v3853_v8 = vpop.f32.mrb[1].mxu0 }
 0x159   :  { %v732_v8 = vrot.slane %v706_v0, %v4675_v3 }
 0x15b   :  { %v304_v9 = vpop.f32.mrb[2].mxu0 }
 0x15c   :  { %v3856_v10 = vpop.f32.mrb[3].mxu0 }
 0x15d   :  { %v4685_v10 = vsub.s32 5, %v4663_v63 }
 0x15f   :  { %v309_v11 = vpop.f32.mrb[4].mxu0 }
 0x160   :  { %v3859_v12 = vpop.f32.mrb[5].mxu0 }
 0x161   :  { %v746_v12 = vrot.slane %v706_v0, %v4685_v10 }
 0x163   :  { %v314_v13 = vpop.f32.mrb[6].mxu0 }
 0x164   :  { %v3862_v14 = vpop.f32.mrb[7].mxu0 }
 0x165   :  { %v4693_v14 = vsub.s32 7, %v4663_v63 }
 0x167   :  { %v319_v15 = vpop.f32.mrb[8].mxu0 }
 0x168   :  { %v3865_v16 = vpop.f32.mrb[9].mxu0 }
 0x169   :  { %v760_v16 = vrot.slane %v706_v0, %v4693_v14 }
 0x16b   :  { %v324_v20 = vpop.f32.mrb[10].mxu0 }
 0x16c   :  { %v3868_v21 = vpop.f32.mrb[11].mxu0 }
 0x16f   :  { %v329_v22 = vpop.f32.mrb[12].mxu0 }
 0x170   :  { %v3871_v23 = vpop.f32.mrb[13].mxu0 }
 0x173   :  { %v334_v24 = vpop.f32.mrb[14].mxu0 }
 0x174   :  { %v3874_v25 = vpop.f32.mrb[15].mxu0 }
 0x177   :  { %v4602_v28 = vpop.f32.mrb[16].mxu0 }
 0x178   :  { %391 = vrot.lane.b32.xlu0 %v4602_v28, %s4354_s15  ;;  %v3877_v29 = vpop.f32.mrb[17].mxu0 }
 0x17b   :  { %v4606_v30 = vpop.f32.mrb[18].mxu0 }
 0x17c   :  { %393 = vrot.lane.b32.xlu1 %v4606_v30, %s4354_s15  ;;  %v3880_v31 = vpop.f32.mrb[19].mxu0 }
 0x17f   :  { %v4610_v32 = vpop.f32.mrb[20].mxu0 }
 0x180   :  { %395 = vrot.lane.b32.xlu0 %v4610_v32, %s4354_s15  ;;  %v3883_v33 = vpop.f32.mrb[21].mxu0 }
 0x183   :  { %v4614_v34 = vpop.f32.mrb[22].mxu0 }
 0x184   :  { %397 = vrot.lane.b32.xlu1 %v4614_v34, %s4354_s15  ;;  %v3886_v35 = vpop.f32.mrb[23].mxu0 }
 0x187   :  { %v4618_v36 = vpop.f32.mrb[24].mxu0 }
 0x188   :  { %399 = vrot.lane.b32.xlu0 %v4618_v36, %s4354_s15  ;;  %v3889_v37 = vpop.f32.mrb[25].mxu0 }
 0x18b   :  { %v4622_v38 = vpop.f32.mrb[26].mxu0 }
 0x18c   :  { %401 = vrot.lane.b32.xlu1 %v4622_v38, %s4354_s15  ;;  %v3892_v39 = vpop.f32.mrb[27].mxu0 }
 0x18f   :  { %v4626_v40 = vpop.f32.mrb[28].mxu0 }
 0x190   :  { %403 = vrot.lane.b32.xlu0 %v4626_v40, %s4354_s15  ;;  %v3895_v41 = vpop.f32.mrb[29].mxu0 }
 0x193   :  { %v4630_v42 = vpop.f32.mrb[30].mxu0 }
 0x194   :  { %405 = vrot.lane.b32.xlu1 %v4630_v42, %s4354_s15  ;;  %v3898_v43 = vpop.f32.mrb[31].mxu0  ;;  %713 = vbcast.lane.b32.xlu0 %v711_v26, 256 }
 0x1ea   :  { %v392_v44 = vpop.permute.xlu0 %391 }
 0x1eb   :  { %v416_v45 = vsel %vm415_vm4, %v299_v7, %v392_v44  ;;  %v718_v7 = vrot.slane %v706_v0, %v4669_v1 }
 0x1ec   :  { %3918 = vmatprep.mubr.msk.f32.mxu1 %vm430_vm5, %v416_v45 }
 0x1ed   :  { %720 = vbcast.lane.b32.xlu1 %v718_v7, 256 }
 0x1ee   :  { %v394_v46 = vpop.permute.xlu1 %393 }
 0x1ef   :  { %v417_v47 = vsel %vm415_vm4, %v304_v9, %v394_v46  ;;  %v725_v9 = vrot.slane %v706_v0, %v4678_v4 }
 0x1f0   :  { %3919 = vmatmul.mubr.msk.f32.vlgmr.msra.gmra.mrb[0].mxu1 %vm430_vm5, %v417_v47 }
 0x1f1   :  { %4210 = vmatpush3.bf16.msra.mxu1 %v4656_v62  ;;  %734 = vbcast.lane.b32.xlu1 %v732_v8, 256 }
 0x1f2   :  { %v396_v48 = vpop.permute.xlu0 %395  ;;  %3946 = vmatprep.subr.mxu1 %v4353_v6  ;;  %727 = vbcast.lane.b32.xlu0 %v725_v9, 256 }
 0x1f3   :  { %v418_v49 = vsel %vm415_vm4, %v309_v11, %v396_v48  ;;  %v4688_v11 = vsub.s32 4, %v4663_v63 }
 0x1f4   :  { %3921 = vmatprep.mubr.msk.f32.mxu1 %vm430_vm5, %v418_v49 }
 0x1f5   :  { %748 = vbcast.lane.b32.xlu1 %v746_v12, 256 }
 0x1f6   :  { %v398_v50 = vpop.permute.xlu1 %397 }
 0x1f7   :  { %v419_v51 = vsel %vm415_vm4, %v314_v13, %v398_v50  ;;  %v739_v13 = vrot.slane %v706_v0, %v4688_v11 }
 0x1f8   :  { %3922 = vmatmul.mubr.msk.f32.gmra.mrb[2].mxu1 %vm430_vm5, %v419_v51 }
 0x1f9   :  { %741 = vbcast.lane.b32.xlu0 %v739_v13, 256  ;;  %762 = vbcast.lane.b32.xlu1 %v760_v16, 256 }
 0x1fa   :  { %v400_v52 = vpop.permute.xlu0 %399 }
 0x1fb   :  { %v420_v53 = vsel %vm415_vm4, %v319_v15, %v400_v52  ;;  %v4696_v15 = vsub.s32 6, %v4663_v63 }
 0x1fc   :  { %3924 = vmatprep.mubr.msk.f32.mxu1 %vm430_vm5, %v420_v53 }
 0x1fd   :  { %v753_v17 = vrot.slane %v706_v0, %v4696_v15 }
 0x1fe   :  { %v402_v54 = vpop.permute.xlu1 %401 }
 0x1ff   :  { %v421_v55 = vsel %vm415_vm4, %v324_v20, %v402_v54  ;;  %755 = vbcast.lane.b32.xlu0 %v753_v17, 256 }
 0x200   :  { %3925 = vmatmul.mubr.msk.f32.gmra.mrb[4].mxu1 %vm430_vm5, %v421_v55 }
 0x202   :  { %v404_v56 = vpop.permute.xlu0 %403 }
 0x203   :  { %v422_v57 = vsel %vm415_vm4, %v329_v22, %v404_v56 }
 0x204   :  { %3927 = vmatprep.mubr.msk.f32.mxu1 %vm430_vm5, %v422_v57 }
 0x206   :  { %v406_v58 = vpop.permute.xlu1 %405  ;;  %v714_v0 = vpop.permute.xlu0 %713 }
 0x207   :  { %v423_v59 = vsel %vm415_vm4, %v334_v24, %v406_v58 }
 0x208   :  { %3928 = vmatmul.mubr.msk.f32.gmra.mrb[6].mxu1 %vm430_vm5, %v423_v59 }
 0x25f   :  { %v721_v61 = vpop.permute.xlu1 %720 }
 0x263   :  { %v735_v12 = vpop.permute.xlu1 %734 }
 0x264   :  { %v728_v13 = vpop.permute.xlu0 %727 }
 0x2c3   :  { %v3920_v19 = vpop.f32.mrb[0].mxu1 }
 0x2c4   :  { %v527_v20 = vadd.f32 %v3920_v19, %v3547_v18  ;;  %v521_v21 = vpop.f32.mrb[1].mxu1 }
 0x2c5   :  { %v522_v22 = vadd.f32 %v3547_v18, %v521_v21  ;;  %v742_v21 = vpop.permute.xlu0 %741 }
 0x2c6   :  { %v561_v23 = vmul.f32 0.01, %v527_v20 }
 0x2c7   :  { %v560_v24 = vmul.f32 0.01, %v522_v22 }
 0x2c8   :  { %v569_v29 = vmax.f32 %v527_v20, %v561_v23  ;;  %v749_v20 = vpop.permute.xlu1 %748 }
 0x2c9   :  { %v568_v25 = vmax.f32 %v522_v22, %v560_v24 }
 0x2cb   :  { %v3923_v31 = vpop.f32.mrb[2].mxu1  ;;  %3934 = vmatprep.mubr.msk.f32.mxu1 %vm576_vm6, %v568_v25 }
 0x2cc   :  { %v537_v33 = vadd.f32 %v3923_v31, %v3547_v18  ;;  %v531_v35 = vpop.f32.mrb[3].mxu1  ;;  %3935 = vmatmul.mubr.msk.f32.vlgmr.msra.gmra.mrb[8].mxu1 %vm576_vm6, %v569_v29  ;;  %v763_v29 = vpop.permute.xlu1 %762 }
 0x2cd   :  { %v532_v37 = vadd.f32 %v3547_v18, %v531_v35  ;;  %v756_v31 = vpop.permute.xlu0 %755 }
 0x2ce   :  { %v563_v39 = vmul.f32 0.01, %v537_v33 }
 0x2cf   :  { %v562_v41 = vmul.f32 0.01, %v532_v37 }
 0x2d0   :  { %v571_v44 = vmax.f32 %v537_v33, %v563_v39 }
 0x2d1   :  { %v570_v43 = vmax.f32 %v532_v37, %v562_v41  ;;  %v76_v41 = vld [vmem:[%s5532_s0 + $0x80] sm:$0xff] }
 0x2d3   :  { %v3926_v45 = vpop.f32.mrb[4].mxu1  ;;  %3937 = vmatprep.mubr.msk.f32.mxu1 %vm576_vm6, %v570_v43 }
 0x2d4   :  { %v547_v46 = vadd.f32 %v3926_v45, %v3547_v18  ;;  %v541_v47 = vpop.f32.mrb[5].mxu1  ;;  %3938 = vmatmul.mubr.msk.f32.gmra.mrb[10].mxu1 %vm576_vm6, %v571_v44  ;;  %v4739_v44 = vsub.s32 %v4496_v27, %v4663_v63 }
 0x2d5   :  { %v542_v48 = vadd.f32 %v3547_v18, %v541_v47 }
 0x2d6   :  { %v565_v49 = vmul.f32 0.01, %v547_v46 }
 0x2d7   :  { %v564_v50 = vmul.f32 0.01, %v542_v48 }
 0x2d8   :  { %v573_v52 = vmax.f32 %v547_v46, %v565_v49 }
 0x2d9   :  { %v572_v51 = vmax.f32 %v542_v48, %v564_v50 }
 0x2db   :  { %v3929_v53 = vpop.f32.mrb[6].mxu1  ;;  %3940 = vmatprep.mubr.msk.f32.mxu1 %vm576_vm6, %v572_v51 }
 0x2dc   :  { %v557_v54 = vadd.f32 %v3929_v53, %v3547_v18  ;;  %v551_v55 = vpop.f32.mrb[7].mxu1  ;;  %3941 = vmatmul.mubr.msk.f32.gmra.mrb[12].mxu1 %vm576_vm6, %v573_v52 }
 0x2dd   :  { %v552_v56 = vadd.f32 %v3547_v18, %v551_v55 }
 0x2de   :  { %v567_v57 = vmul.f32 0.01, %v557_v54 }
 0x2df   :  { %v566_v58 = vmul.f32 0.01, %v552_v56 }
 0x2e0   :  { %v575_v60 = vmax.f32 %v557_v54, %v567_v57 }
 0x2e1   :  { %v574_v59 = vmax.f32 %v552_v56, %v566_v58 }
 0x2e3   :  { %3943 = vmatprep.mubr.msk.f32.mxu1 %vm576_vm6, %v574_v59 }
 0x2e4   :  { %3944 = vmatmul.mubr.msk.f32.gmra.mrb[14].mxu1 %vm576_vm6, %v575_v60 }
 0x2e5   :  { %3948 = vmatprep.mubr.msk.f32.mxu1 %vm4352_vm0, %v4353_v6 }
 0x39f   :  { %v3936_v7 = vpop.f32.mrb[8].mxu1 }
 0x3a0   :  { %v4713_v26 = vadd.f32 %v3936_v7, %v721_v61  ;;  %v667_v8 = vpop.f32.mrb[9].mxu1 }
 0x3a1   :  { %v4715_v9 = vadd.f32 %v714_v0, %v667_v8 }
 0x3a2   :  { %792 = vperm.xlu1 %4283, %v4713_v26  }
 0x3a3   :  { %789 = vperm.xlu0 %4282, %v4715_v9  }
 0x3a7   :  { %v3939_v16 = vpop.f32.mrb[10].mxu1 }
 0x3a8   :  { %v4719_v17 = vadd.f32 %v3939_v16, %v735_v12  ;;  %v677_v18 = vpop.f32.mrb[11].mxu1 }
 0x3a9   :  { %v4721_v19 = vadd.f32 %v728_v13, %v677_v18 }
 0x3aa   :  { %798 = vperm.xlu1 %4283, %v4719_v17  }
 0x3ab   :  { %795 = vperm.xlu0 %4282, %v4721_v19  }
 0x3af   :  { %v3942_v22 = vpop.f32.mrb[12].mxu1 }
 0x3b0   :  { %v4725_v23 = vadd.f32 %v3942_v22, %v749_v20  ;;  %v687_v24 = vpop.f32.mrb[13].mxu1 }
 0x3b1   :  { %v4727_v25 = vadd.f32 %v742_v21, %v687_v24 }
 0x3b2   :  { %804 = vperm.xlu1 %4283, %v4725_v23  }
 0x3b3   :  { %801 = vperm.xlu0 %4282, %v4727_v25  }
 0x3b7   :  { %v3945_v33 = vpop.f32.mrb[14].mxu1 }
 0x3b8   :  { %v779_v35 = vadd.f32 %v3945_v33, %v763_v29  ;;  %v697_v37 = vpop.f32.mrb[15].mxu1 }
 0x3b9   :  { %v4731_v39 = vadd.f32 %v756_v31, %v697_v37 }
 0x3ba   :  { %810 = vperm.xlu1 %4283, %v779_v35  }
 0x3bb   :  { %807 = vperm.xlu0 %4282, %v4731_v39  }
 0x3be   :  { %128 = vperm.xlu1 %4283, %v76_v41  }
 0x421   :  { %v793_v45 = vpop.permute.xlu1 %792 }
 0x422   :  { %v790_v43 = vpop.permute.xlu0 %789  ;;  %v819_v47 = vrot.slane %v793_v45, %v4739_v44 }
 0x423   :  { %v815_v48 = vrot.slane %v790_v43, %v4739_v44 }
 0x425   :  { %v845_v52 = vsel %vm844_vm7, %v819_v47, %v815_v48 }
 0x429   :  { %v799_v49 = vpop.permute.xlu1 %798 }
 0x42a   :  { %v796_v46 = vpop.permute.xlu0 %795  ;;  %v827_v56 = vrot.slane %v799_v49, %v4739_v44 }
 0x42b   :  { %v823_v50 = vrot.slane %v796_v46, %v4739_v44 }
 0x42d   :  { %v847_v53 = vsel %vm846_vm8, %v823_v50, %v845_v52 }
 0x42e   :  { %v849_v57 = vsel %vm848_vm9, %v827_v56, %v847_v53 }
 0x431   :  { %v805_v54 = vpop.permute.xlu1 %804 }
 0x432   :  { %v802_v51 = vpop.permute.xlu0 %801  ;;  %v835_v60 = vrot.slane %v805_v54, %v4739_v44 }
 0x433   :  { %v831_v55 = vrot.slane %v802_v51, %v4739_v44 }
 0x435   :  { %v851_v58 = vsel %vm850_vm10, %v831_v55, %v849_v57 }
 0x436   :  { %v853_v8 = vsel %vm852_vm11, %v835_v60, %v851_v58 }
 0x439   :  { %v811_v59 = vpop.permute.xlu1 %810 }
 0x43a   :  { %v808_v61 = vpop.permute.xlu0 %807  ;;  %v843_v7 = vrot.slane %v811_v59, %v4739_v44 }
 0x43b   :  { %v839_v0 = vrot.slane %v808_v61, %v4739_v44 }
 0x43d   :  { %v129_v12 = vpop.permute.xlu1 %128  ;;  %v855_v13 = vsel %vm854_vm12, %v839_v0, %v853_v8 }
 0x43e   :  { %vm146_vm15 = vcmp.eq.s32.totalorder %v129_v12, %v4496_v27  ;;  %v857_v16 = vsel %vm856_vm13, %v843_v7, %v855_v13 }
 0x43f   :  { %v3529_v18 = vsel %vm146_vm15, 1.0, %v4353_v6  ;;  %v860_v20 = vsel %vm5546_vm14, %v857_v16, -inf }
 0x440   :  { %3900 = vmatmul.mubr.msk.f32.gmra.mrb[32].mxu0 %vm181_vm1, %v3529_v18  ;;  %861 = vmax.xlane.f32.xlu0 %v860_v20 }
 0x4cd   :  { %v862_v21 = vpop.xlane.xlu0 %861 }
 0x4ce   :  { %v867_v22 = vrot.slane %v862_v21, %v4672_v2  ;;  %v871_v24 = vrot.slane %v862_v21, %v4669_v1  ;;  %v895_v29 = vrot.slane %v862_v21, %v4693_v14  ;;  %v875_v31 = vrot.slane %v862_v21, %v4678_v4 }
 0x4cf   :  { %v879_v46 = vrot.slane %v862_v21, %v4675_v3  ;;  %v883_v49 = vrot.slane %v862_v21, %v4688_v11 }
 0x4d0   :  { %v904_v33 = vsub.f32 %v4715_v9, %v867_v22  ;;  %v905_v37 = vsub.f32 %v4713_v26, %v871_v24  ;;  %v911_v41 = vsub.f32 %v779_v35, %v895_v29  ;;  %v906_v48 = vsub.f32 %v4721_v19, %v875_v31 }
 0x4d1   :  { %v907_v51 = vsub.f32 %v4719_v17, %v879_v46  ;;  %v887_v9 = vrot.slane %v862_v21, %v4685_v10  ;;  %v908_v35 = vsub.f32 %v4727_v25, %v883_v49  ;;  %v891_v19 = vrot.slane %v862_v21, %v4696_v15 }
 0x4d2   :  { %v912_v43 = vmul.f32 1.442695, %v904_v33  ;;  %v926_v45 = vmul.f32 1.442695, %v911_v41  ;;  %v914_v47 = vmul.f32 1.442695, %v905_v37 }
 0x4d3   :  { %v916_v50 = vmul.f32 1.442695, %v906_v48  ;;  %v918_v26 = vmul.f32 1.442695, %v907_v51  ;;  %v920_v54 = vmul.f32 1.442695, %v908_v35  ;;  %v909_v17 = vsub.f32 %v4725_v23, %v887_v9 }
 0x4d4   :  { %4284 = vpow2.f32 %v912_v43  ;;  %v910_v25 = vsub.f32 %v4731_v39, %v891_v19 }
 0x4d5   :  { %4286 = vpow2.f32 %v926_v45  ;;  %v922_v56 = vmul.f32 1.442695, %v909_v17 }
 0x4d6   :  { %4288 = vpow2.f32 %v914_v47  ;;  %v924_v58 = vmul.f32 1.442695, %v910_v25 }
 0x4d7   :  { %4290 = vpow2.f32 %v916_v50 }
 0x4d8   :  { %4292 = vpow2.f32 %v918_v26 }
 0x4d9   :  { %4294 = vpow2.f32 %v920_v54 }
 0x4da   :  { %4296 = vpow2.f32 %v922_v56 }
 0x4db   :  { %4298 = vpow2.f32 %v924_v58 }
 0x4de   :  { %v4772_v52 = vpop.eup %4284 }
 0x4df   :  { %v4774_v53 = vpop.eup %4286  ;;  %937 = vperm.xlu1 %4283, %v4772_v52  }
 0x4e0   :  { %958 = vperm.xlu0 %4282, %v4774_v53   ;;  %v4289_v55 = vpop.eup %4288 }
 0x4e1   :  { %v4291_v57 = vpop.eup %4290 }
 0x4e2   :  { %v4293_v59 = vpop.eup %4292 }
 0x4e3   :  { %940 = vperm.xlu1 %4283, %v4289_v55   ;;  %v4295_v60 = vpop.eup %4294 }
 0x4e4   :  { %v4297_v61 = vpop.eup %4296 }
 0x4e5   :  { %v4299_v0 = vpop.eup %4298 }
 0x4e7   :  { %943 = vperm.xlu1 %4283, %v4291_v57  }
 0x4eb   :  { %946 = vperm.xlu1 %4283, %v4293_v59  }
 0x4ef   :  { %949 = vperm.xlu1 %4283, %v4295_v60  }
 0x4f3   :  { %952 = vperm.xlu1 %4283, %v4297_v61  }
 0x4f7   :  { %955 = vperm.xlu1 %4283, %v4299_v0  }
 0x513   :  { %v4781_v23 = vpop.f32.mrb[32].mxu0 }
 0x514   :  { %v3901_v7 = vpop.f32.mrb[33].mxu0 }
 0x55e   :  { %v938_v8 = vpop.permute.xlu1 %937 }
 0x55f   :  { %v963_v21 = vrot.slane %v938_v8, %v4739_v44  ;;  %v959_v37 = vpop.permute.xlu0 %958 }
 0x560   :  { %v991_v48 = vrot.slane %v959_v37, %v4739_v44 }
 0x562   :  { %v941_v12 = vpop.permute.xlu1 %940 }
 0x563   :  { %v967_v18 = vrot.slane %v941_v12, %v4739_v44 }
 0x565   :  { %v992_v31 = vsel %vm844_vm7, %v967_v18, %v963_v21  ;;  %v3575_v21 = vld [vmem:[%s5532_s0 + $0x88] sm:$0xff] }
 0x566   :  { %v944_v13 = vpop.permute.xlu1 %943 }
 0x567   :  { %v971_v20 = vrot.slane %v944_v13, %v4739_v44 }
 0x569   :  { %v993_v41 = vsel %vm846_vm8, %v971_v20, %v992_v31  ;;  %v4810_v20 = vadd.s32 8, %v4663_v63  ;;  %v3577_v31 = vld [vmem:[%s5532_s0 + $0x98] sm:$0xff] }
 0x56a   :  { %v947_v39 = vpop.permute.xlu1 %946 }
 0x56b   :  { %v975_v22 = vrot.slane %v947_v39, %v4739_v44 }
 0x56d   :  { %v994_v43 = vsel %vm848_vm9, %v975_v22, %v993_v41  ;;  %v4833_v22 = vadd.s32 24, %v4663_v63 }
 0x56e   :  { %v950_v16 = vpop.permute.xlu1 %949 }
 0x56f   :  { %v979_v29 = vrot.slane %v950_v16, %v4739_v44 }
 0x571   :  { %v995_v46 = vsel %vm850_vm10, %v979_v29, %v994_v43  ;;  %v3578_v43 = vld [vmem:[%s5532_s0 + $0xa0] sm:$0xff] }
 0x572   :  { %v953_v24 = vpop.permute.xlu1 %952 }
 0x573   :  { %v983_v33 = vrot.slane %v953_v24, %v4739_v44 }
 0x575   :  { %v996_v49 = vsel %vm852_vm11, %v983_v33, %v995_v46  ;;  %v4845_v33 = vadd.s32 32, %v4663_v63 }
 0x576   :  { %v956_v45 = vpop.permute.xlu1 %955 }
 0x577   :  { %v987_v47 = vrot.slane %v956_v45, %v4739_v44 }
 0x579   :  { %v997_v50 = vsel %vm854_vm12, %v987_v47, %v996_v49  ;;  %v3580_v47 = vld [vmem:[%s5532_s0 + $0xb0] sm:$0xff]  ;;  %v3582_v49 = vld [vmem:[%s5532_s0 + $0xc0] sm:$0xff] }
 0x57a   :  { %v998_v51 = vsel %vm856_vm13, %v991_v48, %v997_v50  ;;  %v3584_v50 = vld [vmem:[%s5532_s0 + $0xd0] sm:$0xff] }
 0x57b   :  { %v1000_v9 = vsel %vm5546_vm14, %v998_v51, 0.0  ;;  %v3586_v51 = vld [vmem:[%s5532_s0 + $0xe0] sm:$0xff] }
 0x57c   :  { %1001 = vadd.xlane.f32.xlu1 %v1000_v9  ;;  %v3588_v9 = vld [vmem:[%s5532_s0 + $0xf0] sm:$0xff] }
 0x609   :  { %v1002_v26 = vpop.xlane.xlu1 %1001 }
 0x60a   :  { %4300 = vrcp.f32 %v1002_v26  ;;  %v3590_v26 = vld [vmem:[%s5532_s0 + $0x100] sm:$0xff] }
 0x614   :  { %v4301_v35 = vpop.eup %4300 }
 0x615   :  { %v1024_v19 = vrot.slane %v4301_v35, %v4688_v11  ;;  %v1012_v54 = vrot.slane %v4301_v35, %v4669_v1  ;;  %v1016_v25 = vrot.slane %v4301_v35, %v4678_v4  ;;  %v1008_v7 = vrot.slane %v4301_v35, %v4672_v2 }
 0x616   :  { %v1020_v12 = vrot.slane %v4301_v35, %v4675_v3  ;;  %v1028_v39 = vrot.slane %v4301_v35, %v4685_v10  ;;  %v1036_v18 = vrot.slane %v4301_v35, %v4693_v14 }
 0x617   :  { %v1049_v17 = vmul.f32 %v4295_v60, %v1024_v19  ;;  %v1046_v56 = vmul.f32 %v4289_v55, %v1012_v54  ;;  %v1047_v58 = vmul.f32 %v4291_v57, %v1016_v25  ;;  %v1045_v8 = vmul.f32 %v4772_v52, %v1008_v7  ;;  %v3564_v52 = vld [vmem:[%s5538_s1] ss:$0 sm:$0xff]  ;;  %v3579_v19 = vld [vmem:[%s5532_s0 + $0xa8] sm:$0xff]  ;;  %v3581_v54 = vld [vmem:[%s5532_s0 + $0xb8] sm:$0xff] }
 0x618   :  { %v1048_v13 = vmul.f32 %v4293_v59, %v1020_v12  ;;  %v1050_v16 = vmul.f32 %v4297_v61, %v1028_v39  ;;  %v1032_v55 = vrot.slane %v4301_v35, %v4696_v15  ;;  %v1052_v57 = vmul.f32 %v4774_v53, %v1036_v18  ;;  %v3576_v35 = vld [vmem:[%s5532_s0 + $0x90] sm:$0xff]  ;;  %v3587_v25 = vld [vmem:[%s5532_s0 + $0xe8] sm:$0xff] }
 0x619   :  { %1075 = vperm.xlu1 %4283, %v1049_v17   ;;  %1060 = vperm.xlu0 %4282, %v1046_v56   ;;  %vm1201_vm2 = vcmp.eq.s32.totalorder %v4810_v20, %v3564_v52  ;;  %vm1200_vm3 = vcmp.eq.s32.totalorder %v4663_v63, %v3564_v52  ;;  %v4823_v53 = vadd.s32 16, %v4663_v63  ;;  %v3583_v17 = vld [vmem:[%s5532_s0 + $0xc8] sm:$0xff]  ;;  %v3585_v56 = vld [vmem:[%s5532_s0 + $0xd8] sm:$0xff] }
 0x61a   :  { %v1051_v60 = vmul.f32 %v4299_v0, %v1032_v55  ;;  %v4817_v59 = vsel %vm1201_vm2, 1.0, %v4353_v6  ;;  %v4826_v0 = vsel %vm1200_vm3, 1.0, %v4353_v6  ;;  %vm1203_vm2 = vcmp.eq.s32.totalorder %v4833_v22, %v3564_v52 }
 0x61b   :  { %v1346_v61 = vsel %vm5546_vm14, %v4817_v59, 0.0  ;;  %vm1202_vm15 = vcmp.eq.s32.totalorder %v4823_v53, %v3564_v52  ;;  %v1343_v24 = vsel %vm5546_vm14, %v4826_v0, 0.0  ;;  %v4850_v41 = vsel %vm1203_vm2, 1.0, %v4353_v6 }
 0x61c   :  { %v4838_v29 = vsel %vm1202_vm15, 1.0, %v4353_v6  ;;  %vm1204_vm3 = vcmp.eq.s32.totalorder %v4845_v33, %v3564_v52  ;;  %v1352_v45 = vsel %vm5546_vm14, %v4850_v41, 0.0 }
 0x61d   :  { %1065 = vperm.xlu0 %4282, %v1047_v58   ;;  %v1349_v37 = vsel %vm5546_vm14, %v4838_v29, 0.0  ;;  %v4859_v46 = vsel %vm1204_vm3, 1.0, %v4353_v6  ;;  %v3589_v58 = vld [vmem:[%s5532_s0 + $0xf8] sm:$0xff] }
 0x61e   :  { %v1355_v48 = vsel %vm5546_vm14, %v4859_v46, 0.0 }
 0x621   :  { %1055 = vperm.xlu0 %4282, %v1045_v8  }
 0x625   :  { %1070 = vperm.xlu0 %4282, %v1048_v13  }
 0x629   :  { %1080 = vperm.xlu0 %4282, %v1050_v16  }
 0x62d   :  { %1085 = vperm.xlu0 %4282, %v1051_v60  }
 0x631   :  { %1090 = vperm.xlu0 %4282, %v1052_v57  }
 0x63d   :  { %1347 = vadd.xlane.f32.xlu1 %v1346_v61 }
 0x64e   :  { %1397 = vperm.xlu1 %4283, %v3575_v21  }
 0x650   :  { %1344 = vadd.xlane.f32.xlu0 %v1343_v24 }
 0x652   :  { %1403 = vperm.xlu1 %4283, %v3577_v31  }
 0x654   :  { %1350 = vadd.xlane.f32.xlu0 %v1349_v37 }
 0x656   :  { %1406 = vperm.xlu1 %4283, %v3578_v43  }
 0x658   :  { %1353 = vadd.xlane.f32.xlu0 %v1352_v45 }
 0x65a   :  { %1412 = vperm.xlu1 %4283, %v3580_v47  }
 0x65c   :  { %1356 = vadd.xlane.f32.xlu0 %v1355_v48 }
 0x65e   :  { %1418 = vperm.xlu1 %4283, %v3582_v49  }
 0x662   :  { %1424 = vperm.xlu1 %4283, %v3584_v50  }
 0x666   :  { %1430 = vperm.xlu1 %4283, %v3586_v51  }
 0x66a   :  { %1436 = vperm.xlu1 %4283, %v3588_v9  }
 0x66e   :  { %1442 = vperm.xlu1 %4283, %v3590_v26   ;;  %v1161_v26 = vrot.slane %v4781_v23, 4 }
 0x672   :  { %1400 = vperm.xlu0 %4282, %v3576_v35   ;;  %v1158_v35 = vrot.slane %v4781_v23, 1 }
 0x676   :  { %1409 = vperm.xlu0 %4282, %v3579_v19  }
 0x67a   :  { %1415 = vperm.xlu0 %4282, %v3581_v54  }
 0x67e   :  { %1421 = vperm.xlu0 %4282, %v3583_v17  }
 0x682   :  { %1427 = vperm.xlu0 %4282, %v3585_v56  }
 0x686   :  { %1433 = vperm.xlu0 %4282, %v3587_v25  }
 0x68a   :  { %1439 = vperm.xlu0 %4282, %v3589_v58  }
 0x698   :  { %v1076_v7 = vpop.permute.xlu1 %1075  ;;  %v1061_v8 = vpop.permute.xlu0 %1060 }
 0x699   :  { %v1097_v12 = vmul.f32 %v1076_v7, %v4618_v36  ;;  %v1094_v13 = vmul.f32 %v1061_v8, %v4606_v30 }
 0x69b   :  { %v1129_v39 = vsel %vm415_vm4, %v1097_v12, 0.0  ;;  %v1108_v16 = vsel %vm415_vm4, %v1094_v13, 0.0 }
 0x69c   :  { %v1130_v55 = vrot.slane %v1129_v39, 4  ;;  %v1109_v60 = vrot.slane %v1108_v16, 4  ;;  %v1066_v18 = vpop.permute.xlu0 %1065 }
 0x69d   :  { %v1095_v57 = vmul.f32 %v1066_v18, %v4610_v32 }
 0x69e   :  { %v1131_v52 = vadd.f32 %v1130_v55, %v1129_v39  ;;  %v1110_v61 = vadd.f32 %v1109_v60, %v1108_v16  ;;  %v1159_v55 = vrot.slane %v4781_v23, 2 }
 0x69f   :  { %v1115_v21 = vsel %vm415_vm4, %v1095_v57, 0.0 }
 0x6a0   :  { %v1132_v24 = vrot.slane %v1131_v52, 2  ;;  %v1111_v31 = vrot.slane %v1110_v61, 2  ;;  %v1116_v37 = vrot.slane %v1115_v21, 4  ;;  %v1056_v43 = vpop.permute.xlu0 %1055 }
 0x6a1   :  { %v1093_v36 = vmul.f32 %v1056_v43, %v4602_v28 }
 0x6a2   :  { %v1133_v30 = vadd.f32 %v1132_v24, %v1131_v52  ;;  %v1112_v45 = vadd.f32 %v1111_v31, %v1110_v61  ;;  %v1117_v47 = vadd.f32 %v1116_v37, %v1115_v21 }
 0x6a3   :  { %v1101_v48 = vsel %vm415_vm4, %v1093_v36, 0.0 }
 0x6a4   :  { %v1134_v49 = vrot.slane %v1133_v30, 1  ;;  %v1113_v50 = vrot.slane %v1112_v45, 1  ;;  %v1118_v51 = vrot.slane %v1117_v47, 2  ;;  %v1102_v9 = vrot.slane %v1101_v48, 4  ;;  %v1071_v32 = vpop.permute.xlu0 %1070 }
 0x6a5   :  { %v1096_v19 = vmul.f32 %v1071_v32, %v4614_v34 }
 0x6a6   :  { %v1135_v54 = vadd.f32 %v1134_v49, %v1133_v30  ;;  %v1114_v17 = vadd.f32 %v1113_v50, %v1112_v45  ;;  %v1119_v56 = vadd.f32 %v1118_v51, %v1117_v47  ;;  %v1103_v28 = vadd.f32 %v1102_v9, %v1101_v48 }
 0x6a7   :  { %v1122_v25 = vsel %vm415_vm4, %v1096_v19, 0.0  ;;  %v1160_v19 = vrot.slane %v4781_v23, 3 }
 0x6a8   :  { %v1177_v58 = vadd.f32 %v1161_v26, %v1135_v54  ;;  %v1174_v7 = vadd.f32 %v1158_v35, %v1114_v17  ;;  %v1120_v8 = vrot.slane %v1119_v56, 1  ;;  %v1104_v12 = vrot.slane %v1103_v28, 2  ;;  %v1081_v13 = vpop.permute.xlu0 %1080 }
 0x6a9   :  { %v1123_v39 = vrot.slane %v1122_v25, 4  ;;  %v1098_v16 = vmul.f32 %v1081_v13, %v4622_v38 }
 0x6aa   :  { %v1121_v60 = vadd.f32 %v1120_v8, %v1119_v56  ;;  %v1105_v18 = vadd.f32 %v1104_v12, %v1103_v28  ;;  %v1182_v43 = vmul.f32 0.5, %v1174_v7 }
 0x6ab   :  { %v1124_v57 = vadd.f32 %v1123_v39, %v1122_v25  ;;  %v1136_v34 = vsel %vm415_vm4, %v1098_v16, 0.0  ;;  %v1185_v16 = vmul.f32 0.5, %v1177_v58 }
 0x6ac   :  { %v1175_v52 = vadd.f32 %v1159_v55, %v1121_v60  ;;  %v1106_v61 = vrot.slane %v1105_v18, 1  ;;  %v1086_v21 = vpop.permute.xlu0 %1085  ;;  %v1137_v31 = vrot.slane %v1136_v34, 4  ;;  %v1223_v26 = vrot.slane %v1182_v43, 7 }
 0x6ad   :  { %v1125_v24 = vrot.slane %v1124_v57, 2  ;;  %v1099_v37 = vmul.f32 %v1086_v21, %v4626_v40 }
 0x6ae   :  { %v1107_v36 = vadd.f32 %v1106_v61, %v1105_v18  ;;  %v1183_v30 = vmul.f32 0.5, %v1175_v52  ;;  %v1138_v47 = vadd.f32 %v1137_v31, %v1136_v34  ;;  %v1162_v18 = vrot.slane %v4781_v23, 5 }
 0x6af   :  { %v1126_v45 = vadd.f32 %v1125_v24, %v1124_v57  ;;  %v1143_v38 = vsel %vm415_vm4, %v1099_v37, 0.0  ;;  %v1229_v24 = vrot.slane %v1185_v16, 4  ;;  %v1163_v31 = vrot.slane %v4781_v23, 6 }
 0x6b0   :  { %v1173_v48 = vadd.f32 %v1107_v36, %v4781_v23  ;;  %v1144_v49 = vrot.slane %v1143_v38, 4  ;;  %v1091_v50 = vpop.permute.xlu0 %1090  ;;  %v1139_v9 = vrot.slane %v1138_v47, 2  ;;  %v1225_v54 = vrot.slane %v1183_v30, 6 }
 0x6b1   :  { %v1127_v51 = vrot.slane %v1126_v45, 1  ;;  %v1100_v32 = vmul.f32 %v1091_v50, %v4630_v42 }
 0x6b2   :  { %v1181_v35 = vmul.f32 0.5, %v1173_v48  ;;  %v1145_v40 = vadd.f32 %v1144_v49, %v1143_v38  ;;  %v1140_v56 = vadd.f32 %v1139_v9, %v1138_v47  ;;  %v1164_v49 = vrot.slane %v4781_v23, 7 }
 0x6b3   :  { %v1128_v17 = vadd.f32 %v1127_v51, %v1126_v45  ;;  %v1150_v28 = vsel %vm415_vm4, %v1100_v32, 0.0 }
 0x6b4   :  { %v1224_v25 = vsel %vm844_vm7, %v1223_v26, %v1181_v35  ;;  %v1146_v7 = vrot.slane %v1145_v40, 2  ;;  %v1151_v8 = vrot.slane %v1150_v28, 4  ;;  %v1141_v13 = vrot.slane %v1140_v56, 1 }
 0x6b5   :  { %v1176_v12 = vadd.f32 %v1160_v19, %v1128_v17  ;;  %v1226_v39 = vsel %vm846_vm8, %v1225_v54, %v1224_v25 }
 0x6b6   :  { %v1147_v42 = vadd.f32 %v1146_v7, %v1145_v40  ;;  %v1152_v55 = vadd.f32 %v1151_v8, %v1150_v28  ;;  %v1142_v57 = vadd.f32 %v1141_v13, %v1140_v56 }
 0x6b7   :  { %v1184_v60 = vmul.f32 0.5, %v1176_v12 }
 0x6b8   :  { %v1148_v34 = vrot.slane %v1147_v42, 1  ;;  %v1153_v52 = vrot.slane %v1152_v55, 2  ;;  %v1178_v21 = vadd.f32 %v1162_v18, %v1142_v57 }
 0x6b9   :  { %v1227_v61 = vrot.slane %v1184_v60, 5  ;;  %v4347_v60 = vld [vmem:[%s5533_s5 + $0x18] sm:$0xff] }
 0x6ba   :  { %v1149_v37 = vadd.f32 %v1148_v34, %v1147_v42  ;;  %v1154_v43 = vadd.f32 %v1153_v52, %v1152_v55  ;;  %v1186_v36 = vmul.f32 0.5, %v1178_v21  ;;  %v4346_v42 = vld [vmem:[%s5533_s5 + $0x10] sm:$0xff] }
 0x6bb   :  { %v1228_v30 = vsel %vm848_vm9, %v1227_v61, %v1226_v39 }
 0x6bc   :  { %v1179_v45 = vadd.f32 %v1163_v31, %v1149_v37  ;;  %v1155_v58 = vrot.slane %v1154_v43, 1  ;;  %v1230_v47 = vsel %vm850_vm10, %v1229_v24, %v1228_v30  ;;  %v1231_v38 = vrot.slane %v1186_v36, 3  ;;  %v4348_v31 = vld [vmem:[%s5533_s5 + $0x20] sm:$0xff] }
 0x6be   :  { %v1156_v48 = vadd.f32 %v1155_v58, %v1154_v43  ;;  %v1187_v50 = vmul.f32 0.5, %v1179_v45  ;;  %v1232_v51 = vsel %vm852_vm11, %v1231_v38, %v1230_v47 }
 0x6c0   :  { %v1180_v9 = vadd.f32 %v1164_v49, %v1156_v48  ;;  %v1233_v32 = vrot.slane %v1187_v50, 2 }
 0x6c2   :  { %v1188_v26 = vmul.f32 0.5, %v1180_v9  ;;  %v1234_v35 = vsel %vm854_vm12, %v1233_v32, %v1232_v51 }
 0x6c4   :  { %v1235_v19 = vrot.slane %v1188_v26, 1 }
 0x6c6   :  { %v1236_v40 = vsel %vm856_vm13, %v1235_v19, %v1234_v35 }
 0x6c7   :  { %3947 = vmatpush3.msra.mxu1 %v1236_v40 }
 0x6c8   :  { %3949 = vmatmul.mubr.msk.f32.vlgmr.msra.gmra.mrb[16].mxu1 %vm5546_vm14, %v4826_v0  ;;  %4211 = vmatprep.subr.bf16.mxu1 %v4351_v5 }
 0x6c9   :  { %3951 = vmatprep.mubr.msk.f32.mxu1 %vm4352_vm0, %v4353_v6 }
 0x6ca   :  { %v1348_v54 = vpop.xlane.xlu1 %1347 }
 0x6cb   :  { %vm1359_vm15 = vcmp.gt.f32.partialorder %v1348_v54, 0.0 }
 0x6cc   :  { %3952 = vmatmul.mubr.msk.f32.gmra.mrb[18].mxu1 %vm5546_vm14, %v4817_v59 }
 0x6cd   :  { %3954 = vmatprep.mubr.msk.f32.mxu1 %vm4352_vm0, %v4353_v6 }
 0x6ce   :  { %v1398_v34 = vpop.permute.xlu1 %1397 }
 0x6d0   :  { %3955 = vmatmul.mubr.msk.f32.gmra.mrb[20].mxu1 %vm5546_vm14, %v4838_v29 }
 0x6d1   :  { %3957 = vmatprep.mubr.msk.f32.mxu1 %vm4352_vm0, %v4353_v6 }
 0x6d2   :  { %v1404_v36 = vpop.permute.xlu1 %1403 }
 0x6d4   :  { %3958 = vmatmul.mubr.msk.f32.gmra.mrb[22].mxu1 %vm5546_vm14, %v4850_v41  ;;  %v4344_v41 = vld [vmem:[%s5533_s5] sm:$0xff] }
 0x6d5   :  { %3960 = vmatprep.mubr.msk.f32.mxu1 %vm4352_vm0, %v4353_v6 }
 0x6d6   :  { %v1407_v45 = vpop.permute.xlu1 %1406 }
 0x6d8   :  { %3961 = vmatmul.mubr.msk.f32.gmra.mrb[24].mxu1 %vm5546_vm14, %v4859_v46  ;;  %v4345_v46 = vld [vmem:[%s5533_s5 + $0x8] sm:$0xff] }
 0x6d9   :  { %3973 = vmatprep.mubr.msk.f32.mxu1 %vm4352_vm0, %v4353_v6 }
 0x6da   :  { %v1413_v48 = vpop.permute.xlu1 %1412 }
 0x6dd   :  { %v1345_v23 = vpop.xlane.xlu0 %1344 }
 0x6de   :  { %vm1358_vm2 = vcmp.gt.f32.partialorder %v1345_v23, 0.0  ;;  %v1419_v9 = vpop.permute.xlu1 %1418 }
 0x6e1   :  { %v1351_v59 = vpop.xlane.xlu0 %1350 }
 0x6e2   :  { %vm1360_vm3 = vcmp.gt.f32.partialorder %v1351_v59, 0.0  ;;  %v1425_v19 = vpop.permute.xlu1 %1424 }
 0x6e5   :  { %v1354_v7 = vpop.xlane.xlu0 %1353 }
 0x6e6   :  { %vm1361_vm14 = vcmp.gt.f32.partialorder %v1354_v7, 0.0 }
 0x6e9   :  { %v1357_v39 = vpop.xlane.xlu0 %1356 }
 0x6f1   :  { %v1401_v24 = vpop.permute.xlu0 %1400 }
 0x6f5   :  { %v1410_v47 = vpop.permute.xlu0 %1409 }
 0x6f9   :  { %v1416_v50 = vpop.permute.xlu0 %1415 }
 0x6fd   :  { %v1422_v26 = vpop.permute.xlu0 %1421 }
 0x701   :  { %v1428_v23 = vpop.permute.xlu0 %1427 }
 0x79b   :  { %v1319_v0 = vpop.f32.mrb[16].mxu1 }
 0x79c   :  { %v3950_v29 = vpop.f32.mrb[17].mxu1  ;;  %v4957_v56 = vsel %vm1358_vm2, %v1319_v0, %v4344_v41  ;;  %vm1447_vm2 = vcmp.eq.s32.totalorder %v1398_v34, %v4496_v27  ;;  %v1431_v0 = vpop.permute.xlu1 %1430 }
 0x79d   :  { %v3592_v43 = vsel %vm1447_vm2, 1.0, %v4353_v6  ;;  %vm1451_vm2 = vcmp.eq.s32.totalorder %v1410_v47, %v4496_v27  ;;  %v1434_v29 = vpop.permute.xlu0 %1433 }
 0x79e   :  { %v3596_v49 = vsel %vm1451_vm2, 1.0, %v4353_v6  ;;  %vm1455_vm2 = vcmp.eq.s32.totalorder %v1422_v26, %v4496_v27 }
 0x79f   :  { %v1324_v17 = vpop.f32.mrb[18].mxu1  ;;  %v3600_v40 = vsel %vm1455_vm2, 1.0, %v4353_v6  ;;  %vm1459_vm2 = vcmp.eq.s32.totalorder %v1434_v29, %v4496_v27 }
 0x7a0   :  { %v4962_v28 = vsel %vm1359_vm15, %v1324_v17, %v4345_v46  ;;  %v3953_v25 = vpop.f32.mrb[19].mxu1  ;;  %vm1362_vm15 = vcmp.gt.f32.partialorder %v1357_v39, 0.0  ;;  %v1437_v41 = vpop.permute.xlu1 %1436  ;;  %v3604_v46 = vsel %vm1459_vm2, 1.0, %v4353_v6 }
 0x7a1   :  { %v4212_v8 = vpack.c.bf16 %v4962_v28, %v4957_v56  ;;  %v1440_v25 = vpop.permute.xlu0 %1439 }
 0x7a3   :  { %v1329_v12 = vpop.f32.mrb[20].mxu1  ;;  %4213 = vmatpush3.bf16.msra.mxu1 %v4212_v8 }
 0x7a4   :  { %v3956_v13 = vpop.f32.mrb[21].mxu1  ;;  %4214 = vmatprep.subr.bf16.mxu1 %v4351_v5  ;;  %v4970_v55 = vsel %vm1360_vm3, %v1329_v12, %v4346_v42  ;;  %vm1449_vm3 = vcmp.eq.s32.totalorder %v1404_v36, %v4496_v27  ;;  %v1443_v8 = vpop.permute.xlu1 %1442 }
 0x7a5   :  { %v3594_v58 = vsel %vm1449_vm3, 1.0, %v4353_v6  ;;  %vm1453_vm3 = vcmp.eq.s32.totalorder %v1416_v50, %v4496_v27 }
 0x7a6   :  { %v3598_v32 = vsel %vm1453_vm3, 1.0, %v4353_v6  ;;  %vm1457_vm3 = vcmp.eq.s32.totalorder %v1428_v23, %v4496_v27 }
 0x7a7   :  { %v1334_v16 = vpop.f32.mrb[22].mxu1  ;;  %v3602_v54 = vsel %vm1457_vm3, 1.0, %v4353_v6  ;;  %vm1461_vm3 = vcmp.eq.s32.totalorder %v1440_v25, %v4496_v27 }
 0x7a8   :  { %v4975_v18 = vsel %vm1361_vm14, %v1334_v16, %v4347_v60  ;;  %v3959_v57 = vpop.f32.mrb[23].mxu1  ;;  %vm1448_vm14 = vcmp.eq.s32.totalorder %v1401_v24, %v4496_v27  ;;  %v3606_v12 = vsel %vm1461_vm3, 1.0, %v4353_v6 }
 0x7a9   :  { %v4215_v52 = vpack.c.bf16 %v4975_v18, %v4970_v55  ;;  %v3593_v30 = vsel %vm1448_vm14, 1.0, %v4353_v6  ;;  %vm1452_vm14 = vcmp.eq.s32.totalorder %v1413_v48, %v4496_v27 }
 0x7aa   :  { %v3597_v51 = vsel %vm1452_vm14, 1.0, %v4353_v6  ;;  %vm1456_vm14 = vcmp.eq.s32.totalorder %v1425_v19, %v4496_v27 }
 0x7ab   :  { %v1339_v61 = vpop.f32.mrb[24].mxu1  ;;  %4216 = vmatpush3.bf16.msra.mxu1 %v4215_v52  ;;  %v3601_v59 = vsel %vm1456_vm14, 1.0, %v4353_v6  ;;  %vm1460_vm14 = vcmp.eq.s32.totalorder %v1437_v41, %v4496_v27 }
 0x7ac   :  { %v3962_v21 = vpop.f32.mrb[25].mxu1  ;;  %3971 = vmatprep.subr.mxu1 %v4353_v6  ;;  %v4984_v37 = vsel %vm1362_vm15, %v1339_v61, %v4348_v31  ;;  %vm1450_vm15 = vcmp.eq.s32.totalorder %v1407_v45, %v4496_v27  ;;  %v3605_v7 = vsel %vm1460_vm14, 1.0, %v4353_v6 }
 0x7ad   :  { %v3595_v38 = vsel %vm1450_vm15, 1.0, %v4353_v6  ;;  %vm1454_vm15 = vcmp.eq.s32.totalorder %v1419_v9, %v4496_v27 }
 0x7ae   :  { %v3599_v35 = vsel %vm1454_vm15, 1.0, %v4353_v6  ;;  %vm1458_vm15 = vcmp.eq.s32.totalorder %v1431_v0, %v4496_v27 }
 0x7af   :  { %3972 = vmatpush3.msra.mxu1 %v4984_v37  ;;  %v3603_v17 = vsel %vm1458_vm15, 1.0, %v4353_v6  ;;  %vm1462_vm15 = vcmp.eq.s32.totalorder %v1443_v8, %v4496_v27 }
 0x7b0   :  { %3974 = vmatmul.mubr.msk.f32.vlgmr.msra.gmra.mrb[26].mxu1 %vm181_vm1, %v3592_v43  ;;  %4251 = vmatprep.subr.bf16.mxu1 %v4351_v5  ;;  %v3607_v13 = vsel %vm1462_vm15, 1.0, %v4353_v6 }
 0x7b1   :  { %3976 = vmatprep.mubr.msk.f32.mxu1 %vm4352_vm0, %v4353_v6 }
 0x7b4   :  { %3977 = vmatmul.mubr.msk.f32.gmra.mrb[28].mxu1 %vm181_vm1, %v3593_v30 }
 0x7b5   :  { %3979 = vmatprep.mubr.msk.f32.mxu1 %vm4352_vm0, %v4353_v6 }
 0x7b8   :  { %3980 = vmatmul.mubr.msk.f32.gmra.mrb[30].mxu1 %vm181_vm1, %v3594_v58 }
 0x7b9   :  { %3982 = vmatprep.mubr.msk.f32.mxu1 %vm4352_vm0, %v4353_v6 }
 0x7bc   :  { %3983 = vmatmul.mubr.msk.f32.gmra.mrb[32].mxu1 %vm181_vm1, %v3595_v38 }
 0x7bd   :  { %3985 = vmatprep.mubr.msk.f32.mxu1 %vm4352_vm0, %v4353_v6 }
 0x7c0   :  { %3986 = vmatmul.mubr.msk.f32.gmra.mrb[34].mxu1 %vm181_vm1, %v3596_v49 }
 0x7c1   :  { %3988 = vmatprep.mubr.msk.f32.mxu1 %vm4352_vm0, %v4353_v6 }
 0x7c4   :  { %3989 = vmatmul.mubr.msk.f32.gmra.mrb[36].mxu1 %vm181_vm1, %v3597_v51 }
 0x7c5   :  { %3991 = vmatprep.mubr.msk.f32.mxu1 %vm4352_vm0, %v4353_v6 }
 0x7c8   :  { %3992 = vmatmul.mubr.msk.f32.gmra.mrb[38].mxu1 %vm181_vm1, %v3598_v32 }
 0x7c9   :  { %3994 = vmatprep.mubr.msk.f32.mxu1 %vm4352_vm0, %v4353_v6 }
 0x7cc   :  { %3995 = vmatmul.mubr.msk.f32.gmra.mrb[40].mxu1 %vm181_vm1, %v3599_v35 }
 0x7cd   :  { %3997 = vmatprep.mubr.msk.f32.mxu1 %vm4352_vm0, %v4353_v6 }
 0x7d0   :  { %3998 = vmatmul.mubr.msk.f32.gmra.mrb[42].mxu1 %vm181_vm1, %v3600_v40 }
 0x7d1   :  { %4000 = vmatprep.mubr.msk.f32.mxu1 %vm4352_vm0, %v4353_v6 }
 0x7d4   :  { %4001 = vmatmul.mubr.msk.f32.gmra.mrb[44].mxu1 %vm181_vm1, %v3601_v59 }
 0x7d5   :  { %4003 = vmatprep.mubr.msk.f32.mxu1 %vm4352_vm0, %v4353_v6 }
 0x7d8   :  { %4004 = vmatmul.mubr.msk.f32.gmra.mrb[46].mxu1 %vm181_vm1, %v3602_v54 }
 0x7d9   :  { %4006 = vmatprep.mubr.msk.f32.mxu1 %vm4352_vm0, %v4353_v6 }
 0x7dc   :  { %4007 = vmatmul.mubr.msk.f32.gmra.mrb[48].mxu1 %vm181_vm1, %v3603_v17 }
 0x7dd   :  { %4009 = vmatprep.mubr.msk.f32.mxu1 %vm4352_vm0, %v4353_v6 }
 0x7e0   :  { %4010 = vmatmul.mubr.msk.f32.gmra.mrb[50].mxu1 %vm181_vm1, %v3604_v46 }
 0x7e1   :  { %4012 = vmatprep.mubr.msk.f32.mxu1 %vm4352_vm0, %v4353_v6 }
 0x7e4   :  { %4013 = vmatmul.mubr.msk.f32.gmra.mrb[52].mxu1 %vm181_vm1, %v3605_v7 }
 0x7e5   :  { %4015 = vmatprep.mubr.msk.f32.mxu1 %vm4352_vm0, %v4353_v6 }
 0x7e8   :  { %4016 = vmatmul.mubr.msk.f32.gmra.mrb[54].mxu1 %vm181_vm1, %v3606_v12 }
 0x7e9   :  { %4018 = vmatprep.mubr.msk.f32.mxu1 %vm4352_vm0, %v4353_v6 }
 0x7ec   :  { %4019 = vmatmul.mubr.msk.f32.gmra.mrb[56].mxu1 %vm181_vm1, %v3607_v13 }
 0x7ed   :  { %4021 = vmatprep.mubr.msk.f32.mxu1 %vm4352_vm0, %v4353_v6 }
 0x883   :  { %v1615_v39 = vpop.f32.mrb[26].mxu1 }
 0x884   :  { %v3975_v16 = vpop.f32.mrb[27].mxu1 }
 0x887   :  { %v1620_v42 = vpop.f32.mrb[28].mxu1 }
 0x888   :  { %v3978_v60 = vpop.f32.mrb[29].mxu1 }
 0x88b   :  { %v1625_v57 = vpop.f32.mrb[30].mxu1 }
 0x88c   :  { %v3981_v34 = vpop.f32.mrb[31].mxu1 }
 0x88f   :  { %v1630_v52 = vpop.f32.mrb[32].mxu1 }
 0x890   :  { %v3984_v61 = vpop.f32.mrb[33].mxu1 }
 0x893   :  { %v1635_v21 = vpop.f32.mrb[34].mxu1 }
 0x894   :  { %v3987_v24 = vpop.f32.mrb[35].mxu1 }
 0x897   :  { %v1640_v31 = vpop.f32.mrb[36].mxu1 }
 0x898   :  { %v3990_v43 = vpop.f32.mrb[37].mxu1 }
 0x89b   :  { %v1645_v36 = vpop.f32.mrb[38].mxu1 }
 0x89c   :  { %v3993_v30 = vpop.f32.mrb[39].mxu1 }
 0x89f   :  { %v1650_v45 = vpop.f32.mrb[40].mxu1 }
 0x8a0   :  { %v3996_v58 = vpop.f32.mrb[41].mxu1 }
 0x8a3   :  { %v5067_v47 = vpop.f32.mrb[42].mxu1 }
 0x8a4   :  { %1707 = vrot.lane.b32.xlu0 %v5067_v47, %s4354_s15  ;;  %v3999_v38 = vpop.f32.mrb[43].mxu1 }
 0x8a5   :  { %v4349_v38 = vld [vmem:[%s5537_s7] ss:$0 sm:$0xff] }
 0x8a7   :  { %v5071_v48 = vpop.f32.mrb[44].mxu1 }
 0x8a8   :  { %1709 = vrot.lane.b32.xlu1 %v5071_v48, %s4354_s15  ;;  %v4002_v49 = vpop.f32.mrb[45].mxu1 }
 0x8ab   :  { %v5075_v50 = vpop.f32.mrb[46].mxu1 }
 0x8ac   :  { %1711 = vrot.lane.b32.xlu0 %v5075_v50, %s4354_s15  ;;  %v4005_v51 = vpop.f32.mrb[47].mxu1 }
 0x8af   :  { %v5079_v9 = vpop.f32.mrb[48].mxu1 }
 0x8b0   :  { %1713 = vrot.lane.b32.xlu1 %v5079_v9, %s4354_s15  ;;  %v4008_v32 = vpop.f32.mrb[49].mxu1 }
 0x8b3   :  { %v5083_v26 = vpop.f32.mrb[50].mxu1 }
 0x8b4   :  { %1715 = vrot.lane.b32.xlu0 %v5083_v26, %s4354_s15  ;;  %v4011_v35 = vpop.f32.mrb[51].mxu1 }
 0x8b7   :  { %v5087_v19 = vpop.f32.mrb[52].mxu1 }
 0x8b8   :  { %1717 = vrot.lane.b32.xlu1 %v5087_v19, %s4354_s15  ;;  %v4014_v40 = vpop.f32.mrb[53].mxu1 }
 0x8bb   :  { %v5091_v23 = vpop.f32.mrb[54].mxu1 }
 0x8bc   :  { %1719 = vrot.lane.b32.xlu0 %v5091_v23, %s4354_s15  ;;  %v4017_v59 = vpop.f32.mrb[55].mxu1 }
 0x8bf   :  { %v5095_v0 = vpop.f32.mrb[56].mxu1 }
 0x8c0   :  { %1721 = vrot.lane.b32.xlu1 %v5095_v0, %s4354_s15  ;;  %v4020_v54 = vpop.f32.mrb[57].mxu1 }
 0x916   :  { %v1708_v29 = vpop.permute.xlu0 %1707 }
 0x917   :  { %v1731_v17 = vsel %vm415_vm4, %v1615_v39, %v1708_v29 }
 0x918   :  { %4040 = vmatprep.mubr.msk.f32.mxu0 %vm430_vm5, %v1731_v17 }
 0x91a   :  { %v1710_v41 = vpop.permute.xlu1 %1709 }
 0x91b   :  { %v1732_v46 = vsel %vm415_vm4, %v1620_v42, %v1710_v41 }
 0x91c   :  { %4041 = vmatmul.mubr.msk.f32.vlgmr.msra.gmra.mrb[34].mxu0 %vm430_vm5, %v1732_v46 }
 0x91d   :  { %4236 = vmatpush3.bf16.msra.mxu0 %v4656_v62 }
 0x91e   :  { %v1712_v25 = vpop.permute.xlu0 %1711  ;;  %4068 = vmatprep.subr.mxu0 %v4353_v6 }
 0x91f   :  { %v1733_v7 = vsel %vm415_vm4, %v1625_v57, %v1712_v25 }
 0x920   :  { %4043 = vmatprep.mubr.msk.f32.mxu0 %vm430_vm5, %v1733_v7 }
 0x922   :  { %v1714_v8 = vpop.permute.xlu1 %1713 }
 0x923   :  { %v1734_v12 = vsel %vm415_vm4, %v1630_v52, %v1714_v8  ;;  %v3642_v52 = vld [vmem:[%s5536_s2 + $0x8] sm:$0xff] }
 0x924   :  { %4044 = vmatmul.mubr.msk.f32.gmra.mrb[36].mxu0 %vm430_vm5, %v1734_v12  ;;  %v2026_v61 = vrot.slane %v3642_v52, %v4669_v1  ;;  %v2040_v24 = vrot.slane %v3642_v52, %v4675_v3  ;;  %v2054_v43 = vrot.slane %v3642_v52, %v4685_v10  ;;  %v2068_v30 = vrot.slane %v3642_v52, %v4693_v14 }
 0x926   :  { %v1716_v13 = vpop.permute.xlu0 %1715  ;;  %2028 = vbcast.lane.b32.xlu1 %v2026_v61, 256 }
 0x927   :  { %v1735_v39 = vsel %vm415_vm4, %v1635_v21, %v1716_v13  ;;  %v2019_v21 = vrot.slane %v3642_v52, %v4672_v2 }
 0x928   :  { %4046 = vmatprep.mubr.msk.f32.mxu0 %vm430_vm5, %v1735_v39 }
 0x929   :  { %2021 = vbcast.lane.b32.xlu0 %v2019_v21, 256 }
 0x92a   :  { %v1718_v16 = vpop.permute.xlu1 %1717  ;;  %2042 = vbcast.lane.b32.xlu1 %v2040_v24, 256 }
 0x92b   :  { %v1736_v62 = vsel %vm415_vm4, %v1640_v31, %v1718_v16  ;;  %v2033_v31 = vrot.slane %v3642_v52, %v4678_v4 }
 0x92c   :  { %4047 = vmatmul.mubr.msk.f32.gmra.mrb[38].mxu0 %vm430_vm5, %v1736_v62 }
 0x92d   :  { %2035 = vbcast.lane.b32.xlu0 %v2033_v31, 256 }
 0x92e   :  { %v1720_v42 = vpop.permute.xlu0 %1719  ;;  %2056 = vbcast.lane.b32.xlu1 %v2054_v43, 256 }
 0x92f   :  { %v1737_v60 = vsel %vm415_vm4, %v1645_v36, %v1720_v42  ;;  %v2047_v36 = vrot.slane %v3642_v52, %v4688_v11 }
 0x930   :  { %4049 = vmatprep.mubr.msk.f32.mxu0 %vm430_vm5, %v1737_v60 }
 0x931   :  { %2049 = vbcast.lane.b32.xlu0 %v2047_v36, 256 }
 0x932   :  { %v1722_v57 = vpop.permute.xlu1 %1721  ;;  %2070 = vbcast.lane.b32.xlu1 %v2068_v30, 256 }
 0x933   :  { %v1738_v34 = vsel %vm415_vm4, %v1650_v45, %v1722_v57  ;;  %v2061_v45 = vrot.slane %v3642_v52, %v4696_v15 }
 0x934   :  { %4050 = vmatmul.mubr.msk.f32.gmra.mrb[40].mxu0 %vm430_vm5, %v1738_v34 }
 0x935   :  { %2063 = vbcast.lane.b32.xlu0 %v2061_v45, 256 }
 0x998   :  { %v2029_v45 = vpop.permute.xlu1 %2028 }
 0x9ef   :  { %v4042_v58 = vpop.f32.mrb[34].mxu0 }
 0x9f0   :  { %v1835_v49 = vadd.f32 %v4349_v38, %v4042_v58  ;;  %v1829_v51 = vpop.f32.mrb[35].mxu0  ;;  %v2022_v58 = vpop.permute.xlu0 %2021 }
 0x9f1   :  { %v1830_v32 = vadd.f32 %v4349_v38, %v1829_v51 }
 0x9f2   :  { %v1869_v35 = vmul.f32 0.01, %v1835_v49 }
 0x9f3   :  { %v1868_v40 = vmul.f32 0.01, %v1830_v32 }
 0x9f4   :  { %v1877_v54 = vmax.f32 %v1835_v49, %v1869_v35 }
 0x9f5   :  { %v1876_v59 = vmax.f32 %v1830_v32, %v1868_v40  ;;  %v2036_v40 = vpop.permute.xlu0 %2035 }
 0x9f7   :  { %v4045_v29 = vpop.f32.mrb[36].mxu0  ;;  %4056 = vmatprep.mubr.msk.f32.mxu0 %vm576_vm6, %v1876_v59 }
 0x9f8   :  { %v1845_v17 = vadd.f32 %v4349_v38, %v4045_v29  ;;  %v1839_v41 = vpop.f32.mrb[37].mxu0  ;;  %4057 = vmatmul.mubr.msk.f32.vlgmr.msra.gmra.mrb[42].mxu0 %vm576_vm6, %v1877_v54 }
 0x9f9   :  { %v1840_v46 = vadd.f32 %v4349_v38, %v1839_v41 }
 0x9fa   :  { %v1871_v25 = vmul.f32 0.01, %v1845_v17 }
 0x9fb   :  { %v1870_v7 = vmul.f32 0.01, %v1840_v46 }
 0x9fc   :  { %v1879_v12 = vmax.f32 %v1845_v17, %v1871_v25 }
 0x9fd   :  { %v1878_v8 = vmax.f32 %v1840_v46, %v1870_v7  ;;  %v2050_v46 = vpop.permute.xlu0 %2049 }
 0x9ff   :  { %v4048_v13 = vpop.f32.mrb[38].mxu0  ;;  %4059 = vmatprep.mubr.msk.f32.mxu0 %vm576_vm6, %v1878_v8 }
 0xa00   :  { %v1855_v39 = vadd.f32 %v4349_v38, %v4048_v13  ;;  %v1849_v16 = vpop.f32.mrb[39].mxu0  ;;  %4060 = vmatmul.mubr.msk.f32.gmra.mrb[44].mxu0 %vm576_vm6, %v1879_v12 }
 0xa01   :  { %v1850_v62 = vadd.f32 %v4349_v38, %v1849_v16 }
 0xa02   :  { %v1873_v42 = vmul.f32 0.01, %v1855_v39 }
 0xa03   :  { %v1872_v60 = vmul.f32 0.01, %v1850_v62 }
 0xa04   :  { %v1881_v34 = vmax.f32 %v1855_v39, %v1873_v42  ;;  %v2064_v39 = vpop.permute.xlu0 %2063 }
 0xa05   :  { %v1880_v57 = vmax.f32 %v1850_v62, %v1872_v60 }
 0xa07   :  { %v4051_v52 = vpop.f32.mrb[40].mxu0  ;;  %4062 = vmatprep.mubr.msk.f32.mxu0 %vm576_vm6, %v1880_v57  ;;  %v3591_v57 = vld [vmem:[%s5532_s0 + $0x108] sm:$0xff] }
 0xa08   :  { %v1865_v61 = vadd.f32 %v4349_v38, %v4051_v52  ;;  %v1859_v21 = vpop.f32.mrb[41].mxu0  ;;  %4063 = vmatmul.mubr.msk.f32.gmra.mrb[46].mxu0 %vm576_vm6, %v1881_v34 }
 0xa09   :  { %v1860_v24 = vadd.f32 %v4349_v38, %v1859_v21  ;;  %v2043_v38 = vpop.permute.xlu1 %2042 }
 0xa0a   :  { %v1875_v31 = vmul.f32 0.01, %v1865_v61 }
 0xa0b   :  { %v1874_v43 = vmul.f32 0.01, %v1860_v24 }
 0xa0c   :  { %v1883_v30 = vmax.f32 %v1865_v61, %v1875_v31 }
 0xa0d   :  { %v1882_v36 = vmax.f32 %v1860_v24, %v1874_v43  ;;  %v2057_v41 = vpop.permute.xlu1 %2056 }
 0xa0f   :  { %4065 = vmatprep.mubr.msk.f32.mxu0 %vm576_vm6, %v1882_v36 }
 0xa10   :  { %4066 = vmatmul.mubr.msk.f32.gmra.mrb[48].mxu0 %vm576_vm6, %v1883_v30  ;;  %vm5547_vm6 = vcmask 64512  }
 0xa11   :  { %4070 = vmatprep.mubr.msk.f32.mxu0 %vm4352_vm0, %v4353_v6  ;;  %v2071_v13 = vpop.permute.xlu1 %2070  ;;  %vm5548_vm2 = vmmov %vm5547_vm6 }
 0xa12   :  { %vm5549_vm3 = vmmov %vm5548_vm2 }
 0xacb   :  { %v4058_v49 = vpop.f32.mrb[42].mxu0 }
 0xacc   :  { %v5141_v51 = vadd.f32 %v4058_v49, %v2029_v45  ;;  %v1974_v32 = vpop.f32.mrb[43].mxu0 }
 0xacd   :  { %v5143_v35 = vadd.f32 %v2022_v58, %v1974_v32 }
 0xace   :  { %2100 = vperm.xlu1 %4283, %v5141_v51  }
 0xacf   :  { %2097 = vperm.xlu0 %4282, %v5143_v35  }
 0xad3   :  { %v4061_v59 = vpop.f32.mrb[44].mxu0 }
 0xad4   :  { %v5147_v54 = vadd.f32 %v4061_v59, %v2043_v38  ;;  %v1984_v29 = vpop.f32.mrb[45].mxu0 }
 0xad5   :  { %v2082_v17 = vadd.f32 %v2036_v40, %v1984_v29 }
 0xad6   :  { %2106 = vperm.xlu1 %4283, %v5147_v54  }
 0xad7   :  { %2103 = vperm.xlu0 %4282, %v2082_v17  }
 0xadb   :  { %v4064_v25 = vpop.f32.mrb[46].mxu0 }
 0xadc   :  { %v5150_v7 = vadd.f32 %v4064_v25, %v2057_v41  ;;  %v1994_v8 = vpop.f32.mrb[47].mxu0 }
 0xadd   :  { %v5152_v12 = vadd.f32 %v2050_v46, %v1994_v8 }
 0xade   :  { %2112 = vperm.xlu1 %4283, %v5150_v7  }
 0xadf   :  { %2109 = vperm.xlu0 %4282, %v5152_v12  }
 0xae3   :  { %v4067_v16 = vpop.f32.mrb[48].mxu0 }
 0xae4   :  { %v2087_v62 = vadd.f32 %v4067_v16, %v2071_v13  ;;  %v2004_v42 = vpop.f32.mrb[49].mxu0 }
 0xae5   :  { %v5156_v60 = vadd.f32 %v2064_v39, %v2004_v42 }
 0xae6   :  { %2118 = vperm.xlu1 %4283, %v2087_v62  }
 0xae7   :  { %2115 = vperm.xlu0 %4282, %v5156_v60  }
 0xaea   :  { %1445 = vperm.xlu1 %4283, %v3591_v57  }
 0xb4d   :  { %v2101_v52 = vpop.permute.xlu1 %2100 }
 0xb4e   :  { %v2098_v34 = vpop.permute.xlu0 %2097  ;;  %v2127_v21 = vrot.slane %v2101_v52, %v4739_v44 }
 0xb4f   :  { %v2123_v24 = vrot.slane %v2098_v34, %v4739_v44 }
 0xb51   :  { %v2152_v30 = vsel %vm844_vm7, %v2127_v21, %v2123_v24 }
 0xb55   :  { %v2107_v31 = vpop.permute.xlu1 %2106 }
 0xb56   :  { %v2104_v61 = vpop.permute.xlu0 %2103  ;;  %v2135_v32 = vrot.slane %v2107_v31, %v4739_v44 }
 0xb57   :  { %v2131_v43 = vrot.slane %v2104_v61, %v4739_v44 }
 0xb59   :  { %v2153_v45 = vsel %vm846_vm8, %v2131_v43, %v2152_v30 }
 0xb5a   :  { %v2154_v38 = vsel %vm848_vm9, %v2135_v32, %v2153_v45 }
 0xb5d   :  { %v2113_v58 = vpop.permute.xlu1 %2112 }
 0xb5e   :  { %v2110_v36 = vpop.permute.xlu0 %2109  ;;  %v2143_v29 = vrot.slane %v2113_v58, %v4739_v44 }
 0xb5f   :  { %v2139_v49 = vrot.slane %v2110_v36, %v4739_v44 }
 0xb61   :  { %v2155_v40 = vsel %vm850_vm10, %v2139_v49, %v2154_v38 }
 0xb62   :  { %v2156_v8 = vsel %vm852_vm11, %v2143_v29, %v2155_v40 }
 0xb65   :  { %v2119_v59 = vpop.permute.xlu1 %2118 }
 0xb66   :  { %v2116_v41 = vpop.permute.xlu0 %2115  ;;  %v2151_v25 = vrot.slane %v2119_v59, %v4739_v44 }
 0xb67   :  { %v2147_v46 = vrot.slane %v2116_v41, %v4739_v44 }
 0xb69   :  { %v1446_v13 = vpop.permute.xlu1 %1445  ;;  %v2157_v39 = vsel %vm854_vm12, %v2147_v46, %v2156_v8 }
 0xb6a   :  { %vm1463_vm5 = vcmp.eq.s32.totalorder %v1446_v13, %v4496_v27  ;;  %v2158_v16 = vsel %vm856_vm13, %v2151_v25, %v2157_v39 }
 0xb6b   :  { %v3608_v42 = vsel %vm1463_vm5, 1.0, %v4353_v6  ;;  %v2160_v57 = vsel %vm5547_vm6, %v2158_v16, -inf  ;;  %vm5550_vm6 = vmmov %vm5548_vm2 }
 0xb6c   :  { %4022 = vmatmul.mubr.msk.f32.gmra.mrb[58].mxu1 %vm181_vm1, %v3608_v42  ;;  %2161 = vmax.xlane.f32.xlu0 %v2160_v57 }
 0xb6d   :  { %4132 = vmatprep.mubr.msk.f32.mxu1 %vm4352_vm0, %v4353_v6 }
 0xbf9   :  { %v2162_v34 = vpop.xlane.xlu0 %2161 }
 0xbfa   :  { %v2167_v52 = vrot.slane %v2162_v34, %v4672_v2  ;;  %v2171_v61 = vrot.slane %v2162_v34, %v4669_v1  ;;  %v2195_v21 = vrot.slane %v2162_v34, %v4693_v14  ;;  %v2175_v24 = vrot.slane %v2162_v34, %v4678_v4 }
 0xbfb   :  { %v2179_v45 = vrot.slane %v2162_v34, %v4675_v3  ;;  %v2183_v38 = vrot.slane %v2162_v34, %v4688_v11  ;;  %v2187_v29 = vrot.slane %v2162_v34, %v4685_v10 }
 0xbfc   :  { %v2204_v31 = vsub.f32 %v5143_v35, %v2167_v52  ;;  %v2205_v43 = vsub.f32 %v5141_v51, %v2171_v61  ;;  %v2211_v30 = vsub.f32 %v2087_v62, %v2195_v21  ;;  %v2206_v58 = vsub.f32 %v2082_v17, %v2175_v24 }
 0xbfd   :  { %v2207_v40 = vsub.f32 %v5147_v54, %v2179_v45  ;;  %v2208_v35 = vsub.f32 %v5152_v12, %v2183_v38  ;;  %v2191_v17 = vrot.slane %v2162_v34, %v4696_v15  ;;  %v2209_v41 = vsub.f32 %v5150_v7, %v2187_v29 }
 0xbfe   :  { %v2212_v36 = vmul.f32 1.442695, %v2204_v31  ;;  %v2214_v49 = vmul.f32 1.442695, %v2205_v43  ;;  %v2226_v32 = vmul.f32 1.442695, %v2211_v30 }
 0xbff   :  { %v2216_v59 = vmul.f32 1.442695, %v2206_v58  ;;  %v2218_v51 = vmul.f32 1.442695, %v2207_v40  ;;  %v2220_v46 = vmul.f32 1.442695, %v2208_v35  ;;  %v2210_v25 = vsub.f32 %v5156_v60, %v2191_v17 }
 0xc00   :  { %4302 = vpow2.f32 %v2212_v36  ;;  %v2222_v8 = vmul.f32 1.442695, %v2209_v41 }
 0xc01   :  { %4304 = vpow2.f32 %v2214_v49  ;;  %v2224_v39 = vmul.f32 1.442695, %v2210_v25 }
 0xc02   :  { %4306 = vpow2.f32 %v2226_v32 }
 0xc03   :  { %4308 = vpow2.f32 %v2216_v59 }
 0xc04   :  { %4310 = vpow2.f32 %v2218_v51 }
 0xc05   :  { %4312 = vpow2.f32 %v2220_v46 }
 0xc06   :  { %4314 = vpow2.f32 %v2222_v8 }
 0xc07   :  { %4316 = vpow2.f32 %v2224_v39 }
 0xc0a   :  { %v5194_v62 = vpop.eup %4302 }
 0xc0b   :  { %2237 = vperm.xlu1 %4283, %v5194_v62   ;;  %v4305_v54 = vpop.eup %4304 }
 0xc0c   :  { %v5200_v13 = vpop.eup %4306 }
 0xc0d   :  { %v4309_v12 = vpop.eup %4308  ;;  %2258 = vperm.xlu0 %4282, %v5200_v13  }
 0xc0e   :  { %v4311_v16 = vpop.eup %4310 }
 0xc0f   :  { %2240 = vperm.xlu1 %4283, %v4305_v54   ;;  %v4313_v7 = vpop.eup %4312 }
 0xc10   :  { %v4315_v42 = vpop.eup %4314 }
 0xc11   :  { %v4317_v57 = vpop.eup %4316 }
 0xc13   :  { %2243 = vperm.xlu1 %4283, %v4309_v12  }
 0xc17   :  { %2246 = vperm.xlu1 %4283, %v4311_v16  }
 0xc1b   :  { %2249 = vperm.xlu1 %4283, %v4313_v7  }
 0xc1f   :  { %2252 = vperm.xlu1 %4283, %v4315_v42  }
 0xc23   :  { %2255 = vperm.xlu1 %4283, %v4317_v57  }
 0xc3f   :  { %v5203_v60 = vpop.f32.mrb[58].mxu1 }
 0xc40   :  { %v4023_v34 = vpop.f32.mrb[59].mxu1 }
 0xc8a   :  { %v2238_v52 = vpop.permute.xlu1 %2237 }
 0xc8b   :  { %v2263_v30 = vrot.slane %v2238_v52, %v4739_v44 }
 0xc8c   :  { %v2259_v40 = vpop.permute.xlu0 %2258 }
 0xc8d   :  { %v2291_v41 = vrot.slane %v2259_v40, %v4739_v44 }
 0xc8e   :  { %v2241_v61 = vpop.permute.xlu1 %2240 }
 0xc8f   :  { %v2267_v43 = vrot.slane %v2241_v61, %v4739_v44 }
 0xc91   :  { %v2292_v32 = vsel %vm844_vm7, %v2267_v43, %v2263_v30 }
 0xc92   :  { %v2244_v21 = vpop.permute.xlu1 %2243 }
 0xc93   :  { %v2271_v36 = vrot.slane %v2244_v21, %v4739_v44 }
 0xc95   :  { %v2293_v59 = vsel %vm846_vm8, %v2271_v36, %v2292_v32 }
 0xc96   :  { %v2247_v24 = vpop.permute.xlu1 %2246 }
 0xc97   :  { %v2275_v45 = vrot.slane %v2247_v24, %v4739_v44 }
 0xc99   :  { %v2294_v29 = vsel %vm848_vm9, %v2275_v45, %v2293_v59  ;;  %v2684_v59 = vld [vmem:[%s5539_s3 + $0x8] sm:$0xff] }
 0xc9a   :  { %v2250_v31 = vpop.permute.xlu1 %2249 }
 0xc9b   :  { %v2279_v49 = vrot.slane %v2250_v31, %v4739_v44 }
 0xc9d   :  { %v2295_v51 = vsel %vm850_vm10, %v2279_v49, %v2294_v29  ;;  %v2686_v49 = vld [vmem:[%s5539_s3 + $0x18] sm:$0xff]  ;;  %v2687_v29 = vld [vmem:[%s5539_s3 + $0x20] sm:$0xff] }
 0xc9e   :  { %v2253_v58 = vpop.permute.xlu1 %2252 }
 0xc9f   :  { %v2283_v38 = vrot.slane %v2253_v58, %v4739_v44 }
 0xca1   :  { %v2296_v46 = vsel %vm852_vm11, %v2283_v38, %v2295_v51 }
 0xca2   :  { %v2256_v35 = vpop.permute.xlu1 %2255 }
 0xca3   :  { %v2287_v17 = vrot.slane %v2256_v35, %v4739_v44 }
 0xca5   :  { %v2297_v25 = vsel %vm854_vm12, %v2287_v17, %v2296_v46 }
 0xca6   :  { %v2298_v8 = vsel %vm856_vm13, %v2291_v41, %v2297_v25 }
 0xca7   :  { %v2300_v39 = vsel %vm5548_vm2, %v2298_v8, 0.0 }
 0xca8   :  { %2301 = vadd.xlane.f32.xlu1 %v2300_v39 }
 0xd35   :  { %v2302_v34 = vpop.xlane.xlu1 %2301 }
 0xd36   :  { %4318 = vrcp.f32 %v2302_v34 }
 0xd40   :  { %v4319_v52 = vpop.eup %4318 }
 0xd41   :  { %v2324_v61 = vrot.slane %v4319_v52, %v4688_v11  ;;  %v2312_v21 = vrot.slane %v4319_v52, %v4669_v1  ;;  %v2316_v44 = vrot.slane %v4319_v52, %v4678_v4  ;;  %v2308_v36 = vrot.slane %v4319_v52, %v4672_v2 }
 0xd42   :  { %v2320_v45 = vrot.slane %v4319_v52, %v4675_v3  ;;  %v2328_v11 = vrot.slane %v4319_v52, %v4685_v10  ;;  %v3644_v3 = vld [vmem:[%s5538_s1 + $0x1] ss:$0 sm:$0xff] }
 0xd43   :  { %v2349_v24 = vmul.f32 %v4313_v7, %v2324_v61  ;;  %v2346_v31 = vmul.f32 %v4305_v54, %v2312_v21  ;;  %v2347_v43 = vmul.f32 %v4309_v12, %v2316_v44  ;;  %v2345_v30 = vmul.f32 %v5194_v62, %v2308_v36  ;;  %v2683_v62 = vld [vmem:[%s5539_s3] sm:$0xff] }
 0xd44   :  { %v2348_v58 = vmul.f32 %v4311_v16, %v2320_v45  ;;  %v2350_v1 = vmul.f32 %v4315_v42, %v2328_v11  ;;  %v2332_v54 = vrot.slane %v4319_v52, %v4696_v15  ;;  %v2336_v7 = vrot.slane %v4319_v52, %v4693_v14  ;;  %v2685_v16 = vld [vmem:[%s5539_s3 + $0x10] sm:$0xff] }
 0xd45   :  { %2375 = vperm.xlu1 %4283, %v2349_v24   ;;  %2360 = vperm.xlu0 %4282, %v2346_v31   ;;  %vm2496_vm14 = vcmp.eq.s32.totalorder %v4810_v20, %v3644_v3  ;;  %vm2495_vm15 = vcmp.eq.s32.totalorder %v4663_v63, %v3644_v3  ;;  %vm2497_vm5 = vcmp.eq.s32.totalorder %v4823_v53, %v3644_v3 }
 0xd46   :  { %v2351_v4 = vmul.f32 %v4317_v57, %v2332_v54  ;;  %v2352_v2 = vmul.f32 %v5200_v13, %v2336_v7  ;;  %v5236_v10 = vsel %vm2496_vm14, 1.0, %v4353_v6  ;;  %v5242_v14 = vsel %vm2495_vm15, 1.0, %v4353_v6  ;;  %vm5551_vm14 = vmmov %vm5549_vm3 }
 0xd47   :  { %v2641_v15 = vsel %vm5549_vm3, %v5236_v10, 0.0  ;;  %v2638_v13 = vsel %vm5550_vm6, %v5242_v14, 0.0  ;;  %v5251_v12 = vsel %vm2497_vm5, 1.0, %v4353_v6  ;;  %vm2498_vm2 = vcmp.eq.s32.totalorder %v4833_v22, %v3644_v3  ;;  %vm5552_vm15 = vmmov %vm5550_vm6 }
 0xd48   :  { %v2644_v42 = vsel %vm5551_vm14, %v5251_v12, 0.0  ;;  %v5260_v57 = vsel %vm2498_vm2, 1.0, %v4353_v6  ;;  %vm2499_vm3 = vcmp.eq.s32.totalorder %v4845_v33, %v3644_v3  ;;  %vm5553_vm5 = vmmov %vm5550_vm6  ;;  %v2461_v7 = vrot.slane %v5203_v60, 4 }
 0xd49   :  { %2365 = vperm.xlu0 %4282, %v2347_v43   ;;  %v2647_v32 = vsel %vm5552_vm15, %v5260_v57, 0.0  ;;  %v5269_v38 = vsel %vm2499_vm3, 1.0, %v4353_v6 }
 0xd4a   :  { %v2650_v40 = vsel %vm5553_vm5, %v5269_v38, 0.0 }
 0xd4d   :  { %2355 = vperm.xlu0 %4282, %v2345_v30  }
 0xd51   :  { %2370 = vperm.xlu0 %4282, %v2348_v58  }
 0xd55   :  { %2380 = vperm.xlu0 %4282, %v2350_v1  }
 0xd59   :  { %2385 = vperm.xlu0 %4282, %v2351_v4  }
 0xd5d   :  { %2390 = vperm.xlu0 %4282, %v2352_v2   ;;  %v2458_v2 = vrot.slane %v5203_v60, 1 }
 0xd69   :  { %2642 = vadd.xlane.f32.xlu1 %v2641_v15 }
 0xd7a   :  { %2689 = vperm.xlu1 %4283, %v2683_v62  }
 0xd7c   :  { %2639 = vadd.xlane.f32.xlu0 %v2638_v13 }
 0xd7e   :  { %2695 = vperm.xlu1 %4283, %v2685_v16  }
 0xd80   :  { %2645 = vadd.xlane.f32.xlu0 %v2644_v42 }
 0xd82   :  { %2698 = vperm.xlu1 %4283, %v2686_v49  }
 0xd84   :  { %2648 = vadd.xlane.f32.xlu0 %v2647_v32 }
 0xd88   :  { %2651 = vadd.xlane.f32.xlu0 %v2650_v40 }
 0xd9e   :  { %2692 = vperm.xlu0 %4282, %v2684_v59  }
 0xda2   :  { %2701 = vperm.xlu0 %4282, %v2687_v29  }
 0xdc4   :  { %v2376_v35 = vpop.permute.xlu1 %2375  ;;  %v2361_v51 = vpop.permute.xlu0 %2360 }
 0xdc5   :  { %v2397_v17 = vmul.f32 %v2376_v35, %v5083_v26  ;;  %v2394_v41 = vmul.f32 %v2361_v51, %v5071_v48  ;;  %v2459_v51 = vrot.slane %v5203_v60, 2 }
 0xdc7   :  { %v2429_v46 = vsel %vm415_vm4, %v2397_v17, 0.0  ;;  %v2408_v25 = vsel %vm415_vm4, %v2394_v41, 0.0 }
 0xdc8   :  { %v2430_v8 = vrot.slane %v2429_v46, 4  ;;  %v2409_v39 = vrot.slane %v2408_v25, 4  ;;  %v2366_v34 = vpop.permute.xlu0 %2365 }
 0xdc9   :  { %v2395_v52 = vmul.f32 %v2366_v34, %v5075_v50 }
 0xdca   :  { %v2431_v61 = vadd.f32 %v2430_v8, %v2429_v46  ;;  %v2410_v21 = vadd.f32 %v2409_v39, %v2408_v25 }
 0xdcb   :  { %v2415_v24 = vsel %vm415_vm4, %v2395_v52, 0.0 }
 0xdcc   :  { %v2432_v31 = vrot.slane %v2431_v61, 2  ;;  %v2411_v44 = vrot.slane %v2410_v21, 2  ;;  %v2416_v43 = vrot.slane %v2415_v24, 4  ;;  %v2356_v36 = vpop.permute.xlu0 %2355 }
 0xdcd   :  { %v2393_v26 = vmul.f32 %v2356_v36, %v5067_v47 }
 0xdce   :  { %v2433_v48 = vadd.f32 %v2432_v31, %v2431_v61  ;;  %v2412_v30 = vadd.f32 %v2411_v44, %v2410_v21  ;;  %v2417_v45 = vadd.f32 %v2416_v43, %v2415_v24 }
 0xdcf   :  { %v2401_v58 = vsel %vm415_vm4, %v2393_v26, 0.0 }
 0xdd0   :  { %v2434_v11 = vrot.slane %v2433_v48, 1  ;;  %v2413_v1 = vrot.slane %v2412_v30, 1  ;;  %v2418_v54 = vrot.slane %v2417_v45, 2  ;;  %v2402_v4 = vrot.slane %v2401_v58, 4  ;;  %v2371_v50 = vpop.permute.xlu0 %2370 }
 0xdd1   :  { %v2396_v3 = vmul.f32 %v2371_v50, %v5079_v9 }
 0xdd2   :  { %v2435_v15 = vadd.f32 %v2434_v11, %v2433_v48  ;;  %v2414_v62 = vadd.f32 %v2413_v1, %v2412_v30  ;;  %v2419_v13 = vadd.f32 %v2418_v54, %v2417_v45  ;;  %v2403_v47 = vadd.f32 %v2402_v4, %v2401_v58 }
 0xdd3   :  { %v2422_v16 = vsel %vm415_vm4, %v2396_v3, 0.0  ;;  %v2460_v54 = vrot.slane %v5203_v60, 3 }
 0xdd4   :  { %v2477_v42 = vadd.f32 %v2461_v7, %v2435_v15  ;;  %v2474_v49 = vadd.f32 %v2458_v2, %v2414_v62  ;;  %v2420_v32 = vrot.slane %v2419_v13, 1  ;;  %v2404_v40 = vrot.slane %v2403_v47, 2  ;;  %v2381_v59 = vpop.permute.xlu0 %2380 }
 0xdd5   :  { %v2423_v29 = vrot.slane %v2422_v16, 4  ;;  %v2398_v35 = vmul.f32 %v2381_v59, %v5087_v19  ;;  %v2462_v59 = vrot.slane %v5203_v60, 5 }
 0xdd6   :  { %v2421_v17 = vadd.f32 %v2420_v32, %v2419_v13  ;;  %v2405_v41 = vadd.f32 %v2404_v40, %v2403_v47  ;;  %v2482_v21 = vmul.f32 0.5, %v2474_v49  ;;  %v2485_v49 = vmul.f32 0.5, %v2477_v42 }
 0xdd7   :  { %v2424_v46 = vadd.f32 %v2423_v29, %v2422_v16  ;;  %v2436_v9 = vsel %vm415_vm4, %v2398_v35, 0.0 }
 0xdd8   :  { %v2475_v25 = vadd.f32 %v2459_v51, %v2421_v17  ;;  %v2406_v8 = vrot.slane %v2405_v41, 1  ;;  %v2386_v39 = vpop.permute.xlu0 %2385  ;;  %v2437_v52 = vrot.slane %v2436_v9, 4  ;;  %v2518_v11 = vrot.slane %v2482_v21, 7 }
 0xdd9   :  { %v2425_v34 = vrot.slane %v2424_v46, 2  ;;  %v2399_v61 = vmul.f32 %v2386_v39, %v5091_v23 }
 0xdda   :  { %v2407_v24 = vadd.f32 %v2406_v8, %v2405_v41  ;;  %v2483_v31 = vmul.f32 0.5, %v2475_v25  ;;  %v2438_v43 = vadd.f32 %v2437_v52, %v2436_v9  ;;  %v2463_v9 = vrot.slane %v5203_v60, 6 }
 0xddb   :  { %v2426_v44 = vadd.f32 %v2425_v34, %v2424_v46  ;;  %v2443_v19 = vsel %vm415_vm4, %v2399_v61, 0.0  ;;  %v2524_v46 = vrot.slane %v2485_v49, 4 }
 0xddc   :  { %v2473_v36 = vadd.f32 %v2407_v24, %v5203_v60  ;;  %v2444_v26 = vrot.slane %v2443_v19, 4  ;;  %v2391_v48 = vpop.permute.xlu0 %2390  ;;  %v2439_v45 = vrot.slane %v2438_v43, 2  ;;  %v2520_v4 = vrot.slane %v2483_v31, 6 }
 0xddd   :  { %v2427_v30 = vrot.slane %v2426_v44, 1  ;;  %v2400_v58 = vmul.f32 %v2391_v48, %v5095_v0 }
 0xdde   :  { %v2481_v1 = vmul.f32 0.5, %v2473_v36  ;;  %v2445_v23 = vadd.f32 %v2444_v26, %v2443_v19  ;;  %v2440_v7 = vadd.f32 %v2439_v45, %v2438_v43 }
 0xddf   :  { %v2428_v50 = vadd.f32 %v2427_v30, %v2426_v44  ;;  %v2450_v2 = vsel %vm415_vm4, %v2400_v58, 0.0  ;;  %v2464_v44 = vrot.slane %v5203_v60, 7  ;;  %v2677_v60 = vld [vmem:[%s5540_s10] sm:$0xff] }
 0xde0   :  { %v2519_v3 = vsel %vm844_vm7, %v2518_v11, %v2481_v1  ;;  %v2446_v15 = vrot.slane %v2445_v23, 2  ;;  %v2451_v62 = vrot.slane %v2450_v2, 4  ;;  %v2441_v47 = vrot.slane %v2440_v7, 1  ;;  %vm5554_vm7 = vmmov %vm5553_vm5 }
 0xde1   :  { %v2476_v13 = vadd.f32 %v2460_v54, %v2428_v50  ;;  %v2521_v16 = vsel %vm846_vm8, %v2520_v4, %v2519_v3  ;;  %vm5555_vm8 = vmmov %vm5553_vm5 }
 0xde2   :  { %v2447_v0 = vadd.f32 %v2446_v15, %v2445_v23  ;;  %v2452_v32 = vadd.f32 %v2451_v62, %v2450_v2  ;;  %v2442_v29 = vadd.f32 %v2441_v47, %v2440_v7 }
 0xde3   :  { %v2484_v40 = vmul.f32 0.5, %v2476_v13 }
 0xde4   :  { %v2448_v35 = vrot.slane %v2447_v0, 1  ;;  %v2453_v51 = vrot.slane %v2452_v32, 2  ;;  %v2478_v41 = vadd.f32 %v2462_v59, %v2442_v29  ;;  %v2674_v59 = vld [vmem:[%s5541_s9 + $0x8] sm:$0xff] }
 0xde5   :  { %v2522_v17 = vrot.slane %v2484_v40, 5  ;;  %v2673_v40 = vld [vmem:[%s5541_s9] sm:$0xff] }
 0xde6   :  { %v2449_v25 = vadd.f32 %v2448_v35, %v2447_v0  ;;  %v2454_v8 = vadd.f32 %v2453_v51, %v2452_v32  ;;  %v2486_v39 = vmul.f32 0.5, %v2478_v41 }
 0xde7   :  { %v2523_v34 = vsel %vm848_vm9, %v2522_v17, %v2521_v16  ;;  %vm5556_vm9 = vmmov %vm5553_vm5 }
 0xde8   :  { %v2479_v52 = vadd.f32 %v2463_v9, %v2449_v25  ;;  %v2455_v42 = vrot.slane %v2454_v8, 1  ;;  %v2525_v61 = vsel %vm850_vm10, %v2524_v46, %v2523_v34  ;;  %v2526_v21 = vrot.slane %v2486_v39, 3  ;;  %vm5557_vm10 = vmmov %vm5553_vm5  ;;  %v2675_v34 = vld [vmem:[%s5541_s9 + $0x10] sm:$0xff] }
 0xdea   :  { %v2487_v24 = vmul.f32 0.5, %v2479_v52  ;;  %v2456_v31 = vadd.f32 %v2455_v42, %v2454_v8  ;;  %v2527_v43 = vsel %vm852_vm11, %v2526_v21, %v2525_v61  ;;  %vm5558_vm11 = vmmov %vm5553_vm5  ;;  %v2676_v52 = vld [vmem:[%s5541_s9 + $0x18] sm:$0xff] }
 0xdeb   :  { %v4247_v42 = vpack.c.bf16 %v2676_v52, %v2675_v34 }
 0xdec   :  { %v2480_v19 = vadd.f32 %v2464_v44, %v2456_v31  ;;  %v2528_v36 = vrot.slane %v2487_v24, 2 }
 0xdee   :  { %v2488_v26 = vmul.f32 0.5, %v2480_v19  ;;  %v2529_v48 = vsel %vm854_vm12, %v2528_v36, %v2527_v43 }
 0xdf0   :  { %v2530_v30 = vrot.slane %v2488_v26, 1 }
 0xdf2   :  { %v2531_v45 = vsel %vm856_vm13, %v2530_v30, %v2529_v48 }
 0xdf3   :  { %4069 = vmatpush3.msra.mxu0 %v2531_v45 }
 0xdf4   :  { %4071 = vmatmul.mubr.msk.f32.vlgmr.msra.gmra.mrb[50].mxu0 %vm5554_vm7, %v5242_v14  ;;  %4237 = vmatprep.subr.bf16.mxu0 %v4351_v5  ;;  %v2679_v14 = vld [vmem:[%s5540_s10 + $0x10] sm:$0xff] }
 0xdf5   :  { %4073 = vmatprep.mubr.msk.f32.mxu0 %vm4352_vm0, %v4353_v6 }
 0xdf6   :  { %v2643_v54 = vpop.xlane.xlu1 %2642 }
 0xdf7   :  { %vm2654_vm12 = vcmp.gt.f32.partialorder %v2643_v54, 0.0 }
 0xdf8   :  { %4074 = vmatmul.mubr.msk.f32.gmra.mrb[52].mxu0 %vm5555_vm8, %v5236_v10  ;;  %v2678_v10 = vld [vmem:[%s5540_s10 + $0x8] sm:$0xff] }
 0xdf9   :  { %4076 = vmatprep.mubr.msk.f32.mxu0 %vm4352_vm0, %v4353_v6 }
 0xdfa   :  { %v2690_v0 = vpop.permute.xlu1 %2689 }
 0xdfb   :  { %vm2703_vm3 = vcmp.eq.s32.totalorder %v2690_v0, %v4496_v27 }
 0xdfc   :  { %4077 = vmatmul.mubr.msk.f32.gmra.mrb[54].mxu0 %vm5556_vm9, %v5251_v12  ;;  %v5340_v12 = vpack.c.bf16 %v2678_v10, %v2677_v60  ;;  %v3655_v17 = vsel %vm2703_vm3, 1.0, %v4353_v6  ;;  %v3665_v10 = vld [vmem:[%s5543_s11] ss:$0 sm:$0xff]  ;;  %s4356_s11 = smov 96   ;;  %vm5562_vm3 = vmmov %vm5557_vm10 }
 0xdfd   :  { %4079 = vmatprep.mubr.msk.f32.mxu0 %vm4352_vm0, %v4353_v6 }
 0xdfe   :  { %4253 = vmatpush3.bf16.msra.mxu1 %v5340_v12  ;;  %v2696_v41 = vpop.permute.xlu1 %2695 }
 0xdff   :  { %4254 = vmatprep.subr.bf16.mxu1 %v4351_v5  ;;  %vm2705_vm5 = vcmp.eq.s32.totalorder %v2696_v41, %v4496_v27 }
 0xe00   :  { %4080 = vmatmul.mubr.msk.f32.gmra.mrb[56].mxu0 %vm5557_vm10, %v5260_v57  ;;  %v2680_v57 = vld [vmem:[%s5540_s10 + $0x18] sm:$0xff]  ;;  %v3657_v9 = vsel %vm2705_vm5, 1.0, %v4353_v6  ;;  %vm5564_vm5 = vmmov %vm5562_vm3 }
 0xe01   :  { %4082 = vmatprep.mubr.msk.f32.mxu0 %vm4352_vm0, %v4353_v6 }
 0xe04   :  { %4083 = vmatmul.mubr.msk.f32.gmra.mrb[58].mxu0 %vm5558_vm11, %v5269_v38  ;;  %v5346_v38 = vpack.c.bf16 %v2680_v57, %v2679_v14 }
 0xe05   :  { %4095 = vmatprep.mubr.msk.f32.mxu0 %vm4352_vm0, %v4353_v6 }
 0xe06   :  { %4256 = vmatpush3.bf16.msra.mxu1 %v5346_v38 }
 0xe07   :  { %4263 = vmatprep.subr.bf16.mxu1 %v4351_v5 }
 0xe09   :  { %4133 = vmatmul.mubr.f32.vlgmr.msra.gmra.mrb[60].mxu1 %v4353_v6  ;;  %v2640_v58 = vpop.xlane.xlu0 %2639 }
 0xe0a   :  { %4265 = vmatpush3.bf16.msra.mxu1 %v5340_v12  ;;  %4154 = vmatprep.mubr.msk.f32.mxu1 %vm4352_vm0, %v4353_v6  ;;  %vm2653_vm13 = vcmp.gt.f32.partialorder %v2640_v58, 0.0 }
 0xe0b   :  { %4266 = vmatprep.subr.bf16.mxu1 %v4351_v5 }
 0xe0d   :  { %v2646_v11 = vpop.xlane.xlu0 %2645 }
 0xe0e   :  { %4268 = vmatpush3.bf16.msra.mxu1 %v5346_v38  ;;  %vm2655_vm6 = vcmp.gt.f32.partialorder %v2646_v11, 0.0 }
 0xe0f   :  { %4168 = vmatprep.subr.mxu1 %v4353_v6 }
 0xe11   :  { %v2649_v3 = vpop.xlane.xlu0 %2648 }
 0xe12   :  { %vm2656_vm2 = vcmp.gt.f32.partialorder %v2649_v3, 0.0 }
 0xe15   :  { %v2652_v47 = vpop.xlane.xlu0 %2651 }
 0xe16   :  { %vm2657_vm14 = vcmp.gt.f32.partialorder %v2652_v47, 0.0 }
 0xe1d   :  { %v2693_v35 = vpop.permute.xlu0 %2692 }
 0xe1e   :  { %vm2704_vm15 = vcmp.eq.s32.totalorder %v2693_v35, %v4496_v27 }
 0xe1f   :  { %v3656_v46 = vsel %vm2704_vm15, 1.0, %v4353_v6  ;;  %vm5563_vm15 = vmmov %vm5562_vm3 }
 0xe21   :  { %v2702_v25 = vpop.permute.xlu0 %2701 }
 0xe22   :  { %vm2707_vm8 = vcmp.eq.s32.totalorder %v2702_v25, %v4496_v27 }
 0xe23   :  { %v3659_v39 = vsel %vm2707_vm8, 1.0, %v4353_v6  ;;  %vm5566_vm8 = vmmov %vm5562_vm3 }
 0xec7   :  { %v2614_v1 = vpop.f32.mrb[50].mxu0 }
 0xec8   :  { %v4072_v23 = vpop.f32.mrb[51].mxu0  ;;  %v5359_v50 = vsel %vm2653_vm13, %v2614_v1, %v4957_v56  ;;  %vm5560_vm13 = vmmov %vm5557_vm10 }
 0xecb   :  { %v2619_v4 = vpop.f32.mrb[52].mxu0 }
 0xecc   :  { %v5362_v7 = vsel %vm2654_vm12, %v2619_v4, %v4962_v28  ;;  %v4075_v2 = vpop.f32.mrb[53].mxu0  ;;  %vm5559_vm12 = vmmov %vm5557_vm10 }
 0xecd   :  { %v4238_v15 = vpack.c.bf16 %v5362_v7, %v5359_v50 }
 0xecf   :  { %v2624_v62 = vpop.f32.mrb[54].mxu0  ;;  %4239 = vmatpush3.bf16.msra.mxu0 %v4238_v15 }
 0xed0   :  { %v4078_v13 = vpop.f32.mrb[55].mxu0  ;;  %4240 = vmatprep.subr.bf16.mxu0 %v4351_v5  ;;  %v5368_v56 = vsel %vm2655_vm6, %v2624_v62, %v4970_v55 }
 0xed3   :  { %v2629_v16 = vpop.f32.mrb[56].mxu0 }
 0xed4   :  { %v5371_v28 = vsel %vm2656_vm2, %v2629_v16, %v4975_v18  ;;  %v4081_v49 = vpop.f32.mrb[57].mxu0  ;;  %v4243_v18 = vpack.c.bf16 %v2674_v59, %v2673_v40 }
 0xed5   :  { %v4241_v32 = vpack.c.bf16 %v5371_v28, %v5368_v56 }
 0xed7   :  { %v2634_v29 = vpop.f32.mrb[58].mxu0  ;;  %4242 = vmatpush3.bf16.msra.mxu0 %v4241_v32 }
 0xed8   :  { %4093 = vmatprep.subr.mxu0 %v4353_v6  ;;  %v4084_v55 = vpop.f32.mrb[59].mxu0  ;;  %v5384_v51 = vsel %vm2657_vm14, %v2634_v29, %v4984_v37  ;;  %v2699_v37 = vpop.permute.xlu1 %2698  ;;  %vm5561_vm14 = vmmov %vm5557_vm10 }
 0xed9   :  { %vm2706_vm7 = vcmp.eq.s32.totalorder %v2699_v37, %v4496_v27  ;;  %v5419_v27 = vld [vmem:[%s5542_s12] ss:$0 sm:$0xff] }
 0xeda   :  { %v3658_v8 = vsel %vm2706_vm7, 1.0, %v4353_v6  ;;  %vm5565_vm7 = vmmov %vm5562_vm3 }
 0xedb   :  { %4094 = vmatpush3.msra.mxu0 %v5384_v51 }
 0xedc   :  { %4096 = vmatmul.mubr.msk.f32.vlgmr.msra.gmra.mrb[60].mxu0 %vm181_vm1, %v3655_v17  ;;  %4244 = vmatprep.subr.bf16.mxu0 %v4243_v18  ;;  %v3001_v61 = vpop.f32.mrb[60].mxu1 }
 0xedd   :  { %4098 = vmatprep.mubr.msk.f32.mxu0 %vm4352_vm0, %v4353_v6  ;;  %4246 = vmatpush3.bf16.msra.mxu0 %v4243_v18  ;;  %v3002_v21 = vadd.f32 %v5419_v27, %v3001_v61  ;;  %v4134_v24 = vpop.f32.mrb[61].mxu1 }
 0xede   :  { %4248 = vmatprep.subr.bf16.mxu0 %v4247_v42 }
 0xedf   :  { %3013 = vrot.lane.b32.xlu1 %v3002_v21, %s4355_s8 }
 0xee0   :  { %4099 = vmatmul.mubr.msk.f32.gmra.mrb[62].mxu0 %vm181_vm1, %v3656_v46 }
 0xee1   :  { %4101 = vmatprep.mubr.msk.f32.mxu0 %vm4352_vm0, %v4353_v6  ;;  %4250 = vmatpush3.bf16.msra.mxu0 %v4247_v42 }
 0xee2   :  { %4257 = vmatprep.subr.bf16.mxu0 %v4351_v5 }
 0xee4   :  { %4102 = vmatmul.mubr.msk.f32.gmra.mrb[64].mxu0 %vm181_vm1, %v3657_v9 }
 0xee5   :  { %4104 = vmatprep.mubr.msk.f32.mxu0 %vm4352_vm0, %v4353_v6 }
 0xee8   :  { %4105 = vmatmul.mubr.msk.f32.gmra.mrb[66].mxu0 %vm181_vm1, %v3658_v8 }
 0xee9   :  { %4107 = vmatprep.mubr.msk.f32.mxu0 %vm4352_vm0, %v4353_v6 }
 0xeec   :  { %4108 = vmatmul.mubr.msk.f32.gmra.mrb[68].mxu0 %vm181_vm1, %v3659_v39 }
 0xf51   :  { %v3014_v13 = vpop.permute.xlu1 %3013 }
 0xfaf   :  { %v2799_v31 = vpop.f32.mrb[60].mxu0 }
 0xfb0   :  { %v4097_v44 = vpop.f32.mrb[61].mxu0  ;;  %4118 = vmatprep.mubr.msk.f32.mxu0 %vm415_vm4, %v2799_v31 }
 0xfb3   :  { %v2804_v43 = vpop.f32.mrb[62].mxu0 }
 0xfb4   :  { %v4100_v19 = vpop.f32.mrb[63].mxu0  ;;  %4119 = vmatmul.mubr.msk.f32.vlgmr.msra.gmra.mrb[70].mxu0 %vm415_vm4, %v2804_v43 }
 0xfb5   :  { %4259 = vmatpush3.bf16.msra.mxu0 %v5340_v12 }
 0xfb6   :  { %4260 = vmatprep.subr.bf16.mxu0 %v4351_v5 }
 0xfb7   :  { %v2809_v36 = vpop.f32.mrb[64].mxu0 }
 0xfb8   :  { %v4103_v26 = vpop.f32.mrb[65].mxu0  ;;  %4121 = vmatprep.mubr.msk.f32.mxu0 %vm415_vm4, %v2809_v36 }
 0xfb9   :  { %4262 = vmatpush3.bf16.msra.mxu0 %v5346_v38 }
 0xfba   :  { %4269 = vmatprep.subr.bf16.mxu0 %v4351_v5 }
 0xfbb   :  { %v2814_v48 = vpop.f32.mrb[66].mxu0 }
 0xfbc   :  { %v4106_v30 = vpop.f32.mrb[67].mxu0  ;;  %4122 = vmatmul.mubr.msk.f32.gmra.mrb[72].mxu0 %vm415_vm4, %v2814_v48 }
 0xfbd   :  { %4143 = vmatprep.mubr.msk.f32.mxu0 %vm4352_vm0, %v4353_v6 }
 0xfbf   :  { %v5433_v45 = vpop.f32.mrb[68].mxu0 }
 0xfc0   :  { %v4109_v60 = vpop.f32.mrb[69].mxu0 }
0x1087   :  { %v4120_v14 = vpop.f32.mrb[70].mxu0 }
0x1088   :  { %v2913_v57 = vadd.f32 %v4120_v14, %v3665_v10  ;;  %v2907_v58 = vpop.f32.mrb[71].mxu0 }
0x1089   :  { %v2908_v11 = vadd.f32 %v3665_v10, %v2907_v58 }
0x108b   :  { %v3005_v1 = vadd.f32 %v3002_v21, %v2908_v11 }
0x108d   :  { %v3671_v54 = vmul.f32 -1.442695, %v3005_v1 }
0x108f   :  { %4320 = vpow2.f32 %v3671_v54  ;;  %v4123_v23 = vpop.f32.mrb[72].mxu0 }
0x1090   :  { %v5438_v4 = vadd.f32 %v4123_v23, %v3665_v10  ;;  %v2917_v2 = vpop.f32.mrb[73].mxu0 }
0x1091   :  { %v5440_v3 = vadd.f32 %v3665_v10, %v2917_v2 }
0x1099   :  { %v4321_v15 = vpop.eup %4320 }
0x109a   :  { %v3009_v62 = vadd.f32 1.0, %v4321_v15 }
0x109c   :  { %4322 = vrcp.f32 %v3009_v62 }
0x10a6   :  { %v4323_v47 = vpop.eup %4322 }
0x10a7   :  { %v3016_v16 = vmul.f32 %v4323_v47, %v3014_v13  ;;  %v3023_v40 = vsub.f32 1.0, %v4323_v47  ;;  %v3029_v29 = vmul.f32 0.0, %v4323_v47 }
0x10a9   :  { %3018 = vrot.lane.b32.xlu0 %v3016_v16, %s4355_s8 }
0x111b   :  { %v3019_v49 = vpop.permute.xlu0 %3018 }
0x111c   :  { %v3021_v0 = vadd.f32 %v3019_v49, %v2908_v11 }
0x111e   :  { %4324 = vtanh.f32 %v3021_v0 }
0x1128   :  { %v4325_v32 = vpop.eup %4324 }
0x1129   :  { %3025 = vrot.lane.b32.xlu1 %v4325_v32, %s4356_s11 }
0x119b   :  { %v3026_v59 = vpop.permute.xlu1 %3025 }
0x119c   :  { %v3028_v55 = vmul.f32 %v3026_v59, %v3023_v40 }
0x119e   :  { %v3030_v18 = vadd.f32 %v3029_v29, %v3028_v55 }
0x11a0   :  { %3032 = vrot.lane.b32.xlu0 %v3030_v18, %s4356_s11 }
0x1212   :  { %v3033_v35 = vpop.permute.xlu0 %3032 }
0x1213   :  { %4144 = vmatmul.mubr.msk.f32.vlgmr.msra.gmra.mrb[74].mxu0 %vm415_vm4, %v3033_v35 }
0x1214   :  { %4271 = vmatpush3.bf16.msra.mxu0 %v5340_v12  ;;  %4165 = vmatprep.mubr.msk.f32.mxu0 %vm4352_vm0, %v4353_v6 }
0x1215   :  { %4272 = vmatprep.subr.bf16.mxu0 %v4351_v5 }
0x1218   :  { %4274 = vmatpush3.bf16.msra.mxu0 %v5346_v38 }
0x12e6   :  { %v3102_v17 = vpop.f32.mrb[74].mxu0 }
0x12e7   :  { %v3103_v41 = vadd.f32 %v5419_v27, %v3102_v17  ;;  %v4145_v46 = vpop.f32.mrb[75].mxu0 }
0x12e9   :  { %3114 = vrot.lane.b32.xlu1 %v3103_v41, %s4355_s8  ;;  %v3106_v37 = vadd.f32 %v3103_v41, %v2913_v57 }
0x12eb   :  { %v3673_v9 = vmul.f32 -1.442695, %v3106_v37 }
0x12ed   :  { %4326 = vpow2.f32 %v3673_v9 }
0x12f7   :  { %v4327_v25 = vpop.eup %4326 }
0x12f8   :  { %v3110_v8 = vadd.f32 1.0, %v4327_v25 }
0x12fa   :  { %4328 = vrcp.f32 %v3110_v8 }
0x1304   :  { %v4329_v12 = vpop.eup %4328 }
0x1305   :  { %v3124_v42 = vsub.f32 1.0, %v4329_v12  ;;  %v3130_v21 = vmul.f32 %v4329_v12, %v3030_v18 }
0x135b   :  { %v3115_v39 = vpop.permute.xlu1 %3114 }
0x135c   :  { %v3117_v34 = vmul.f32 %v4329_v12, %v3115_v39  ;;  %v3678_v12 = vld [vmem:[%s5544_s4] ss:$0 sm:$0xff] }
0x135d   :  { %vm3345_vm1 = vcmp.eq.s32.totalorder %v4663_v63, %v3678_v12  ;;  %vm3347_vm9 = vcmp.eq.s32.totalorder %v4823_v53, %v3678_v12  ;;  %vm3348_vm11 = vcmp.eq.s32.totalorder %v4833_v22, %v3678_v12  ;;  %vm3346_vm6 = vcmp.eq.s32.totalorder %v4810_v20, %v3678_v12 }
0x135e   :  { %3119 = vrot.lane.b32.xlu0 %v3117_v34, %s4355_s8  ;;  %v3681_v34 = vsel %vm3347_vm9, 1.0, %v4353_v6  ;;  %v3680_v63 = vsel %vm3346_vm6, 1.0, %v4353_v6  ;;  %vm3349_vm2 = vcmp.eq.s32.totalorder %v4845_v33, %v3678_v12 }
0x135f   :  { %v3472_v53 = vsel %vm5561_vm14, %v3680_v63, 0.0 }
0x13d0   :  { %v3120_v5 = vpop.permute.xlu0 %3119 }
0x13d1   :  { %v3122_v52 = vadd.f32 %v3120_v5, %v2913_v57  ;;  %v3475_v5 = vsel %vm5559_vm12, %v3681_v34, 0.0 }
0x13d3   :  { %4330 = vtanh.f32 %v3122_v52  ;;  %v3682_v52 = vsel %vm3348_vm11, 1.0, %v4353_v6 }
0x13dd   :  { %v4331_v38 = vpop.eup %4330 }
0x13de   :  { %3126 = vrot.lane.b32.xlu1 %v4331_v38, %s4356_s11  ;;  %v3478_v38 = vsel %vm5560_vm13, %v3682_v52, 0.0 }
0x1450   :  { %v3127_v61 = vpop.permute.xlu1 %3126 }
0x1451   :  { %v3129_v24 = vmul.f32 %v3127_v61, %v3124_v42  ;;  %v3683_v42 = vsel %vm3349_vm2, 1.0, %v4353_v6 }
0x1452   :  { %v3481_v22 = vsel %vm5562_vm3, %v3683_v42, 0.0 }
0x1453   :  { %v3131_v31 = vadd.f32 %v3130_v21, %v3129_v24 }
0x1455   :  { %3133 = vrot.lane.b32.xlu0 %v3131_v31, %s4356_s11 }
0x14c7   :  { %v3134_v44 = vpop.permute.xlu0 %3133 }
0x14c8   :  { %4155 = vmatmul.mubr.msk.f32.vlgmr.msra.gmra.mrb[62].mxu1 %vm415_vm4, %v3134_v44 }
0x14c9   :  { %4170 = vmatprep.mubr.msk.f32.mxu1 %vm4352_vm0, %v4353_v6 }
0x159b   :  { %v3203_v43 = vpop.f32.mrb[62].mxu1 }
0x159c   :  { %v3204_v19 = vadd.f32 %v5419_v27, %v3203_v43  ;;  %v4156_v36 = vpop.f32.mrb[63].mxu1 }
0x159e   :  { %3215 = vrot.lane.b32.xlu1 %v3204_v19, %s4355_s8  ;;  %v3207_v26 = vadd.f32 %v3204_v19, %v5440_v3 }
0x15a0   :  { %v3675_v48 = vmul.f32 -1.442695, %v3207_v26 }
0x15a2   :  { %4332 = vpow2.f32 %v3675_v48 }
0x15ac   :  { %v4333_v30 = vpop.eup %4332 }
0x15ad   :  { %v3211_v60 = vadd.f32 1.0, %v4333_v30 }
0x15af   :  { %4334 = vrcp.f32 %v3211_v60 }
0x15b9   :  { %v4335_v10 = vpop.eup %4334 }
0x15ba   :  { %v3225_v54 = vsub.f32 1.0, %v4335_v10  ;;  %v3231_v2 = vmul.f32 %v4335_v10, %v3131_v31 }
0x1610   :  { %v3216_v14 = vpop.permute.xlu1 %3215 }
0x1611   :  { %v3218_v57 = vmul.f32 %v4335_v10, %v3216_v14 }
0x1613   :  { %3220 = vrot.lane.b32.xlu0 %v3218_v57, %s4355_s8 }
0x1685   :  { %v3221_v58 = vpop.permute.xlu0 %3220 }
0x1686   :  { %v3223_v11 = vadd.f32 %v3221_v58, %v5440_v3 }
0x1688   :  { %4336 = vtanh.f32 %v3223_v11 }
0x1692   :  { %v4337_v1 = vpop.eup %4336 }
0x1693   :  { %3227 = vrot.lane.b32.xlu1 %v4337_v1, %s4356_s11 }
0x1705   :  { %v3228_v23 = vpop.permute.xlu1 %3227 }
0x1706   :  { %v3230_v15 = vmul.f32 %v3228_v23, %v3225_v54 }
0x1708   :  { %v3232_v62 = vadd.f32 %v3231_v2, %v3230_v15 }
0x170a   :  { %3234 = vrot.lane.b32.xlu0 %v3232_v62, %s4356_s11 }
0x177c   :  { %v3235_v13 = vpop.permute.xlu0 %3234 }
0x177d   :  { %4166 = vmatmul.mubr.msk.f32.vlgmr.msra.gmra.mrb[76].mxu0 %vm415_vm4, %v3235_v13 }
0x1850   :  { %v3304_v47 = vpop.f32.mrb[76].mxu0 }
0x1851   :  { %v3305_v16 = vadd.f32 %v5419_v27, %v3304_v47  ;;  %v4167_v49 = vpop.f32.mrb[77].mxu0 }
0x1853   :  { %3316 = vrot.lane.b32.xlu1 %v3305_v16, %s4355_s8  ;;  %v3308_v3 = vadd.f32 %v3305_v16, %v5438_v4 }
0x1855   :  { %v3677_v0 = vmul.f32 -1.442695, %v3308_v3 }
0x1857   :  { %4338 = vpow2.f32 %v3677_v0 }
0x1861   :  { %v4339_v32 = vpop.eup %4338 }
0x1862   :  { %v3312_v40 = vadd.f32 1.0, %v4339_v32 }
0x1864   :  { %4340 = vrcp.f32 %v3312_v40 }
0x186e   :  { %v4341_v59 = vpop.eup %4340 }
0x186f   :  { %v3326_v17 = vsub.f32 1.0, %v4341_v59  ;;  %v3332_v46 = vmul.f32 %v4341_v59, %v3232_v62 }
0x18c5   :  { %v3317_v29 = vpop.permute.xlu1 %3316 }
0x18c6   :  { %v3319_v55 = vmul.f32 %v4341_v59, %v3317_v29 }
0x18c8   :  { %3321 = vrot.lane.b32.xlu0 %v3319_v55, %s4355_s8 }
0x18cc   :  { %3335 = vrot.lane.b32.xlu0 %v5433_v45, %s4354_s15  ;;  %v3679_v45 = vsel %vm3345_vm1, 1.0, %v4353_v6  ;;  %vm5567_vm1 = vmmov %vm5562_vm3 }
0x193a   :  { %v3322_v18 = vpop.permute.xlu0 %3321 }
0x193b   :  { %v3324_v27 = vadd.f32 %v3322_v18, %v5438_v4  ;;  %v3469_v4 = vsel %vm5557_vm10, %v3679_v45, 0.0 }
0x193c   :  { %3470 = vadd.xlane.f32.xlu0 %v3469_v4 }
0x193d   :  { %4342 = vtanh.f32 %v3324_v27 }
0x193e   :  { %v3336_v25 = vpop.permute.xlu0 %3335 }
0x1940   :  { %3476 = vadd.xlane.f32.xlu0 %v3475_v5 }
0x1944   :  { %3479 = vadd.xlane.f32.xlu0 %v3478_v38 }
0x1947   :  { %v4343_v35 = vpop.eup %4342 }
0x1948   :  { %3328 = vrot.lane.b32.xlu1 %v4343_v35, %s4356_s11 }
0x19ba   :  { %v3329_v41 = vpop.permute.xlu1 %3328 }
0x19bb   :  { %v3331_v37 = vmul.f32 %v3329_v41, %v3326_v17 }
0x19bd   :  { %v3333_v9 = vadd.f32 %v3332_v46, %v3331_v37 }
0x19bf   :  { %v3338_v8 = vadd.f32 %v3336_v25, %v3333_v9 }
0x19c1   :  { %v3339_v39 = vmul.f32 0.5, %v3338_v8 }
0x19c3   :  { %3361 = vrot.lane.b32.xlu1 %v3339_v39, %s4356_s11 }
0x19c9   :  { %v3471_v20 = vpop.xlane.xlu0 %3470 }
0x19ca   :  { %vm3484_vm9 = vcmp.gt.f32.partialorder %v3471_v20, 0.0 }
0x19cd   :  { %v3477_v44 = vpop.xlane.xlu0 %3476 }
0x19d1   :  { %v3480_v36 = vpop.xlane.xlu0 %3479 }
0x19d2   :  { %vm3487_vm11 = vcmp.gt.f32.partialorder %v3480_v36, 0.0 }
0x19e7   :  { %3473 = vadd.xlane.f32.xlu1 %v3472_v53 }
0x19eb   :  { %3482 = vadd.xlane.f32.xlu1 %v3481_v22 }
0x1a35   :  { %v3362_v61 = vpop.permute.xlu1 %3361 }
0x1a36   :  { %4169 = vmatpush3.msra.mxu1 %v3362_v61 }
0x1a37   :  { %4171 = vmatmul.mubr.msk.f32.vlgmr.msra.gmra.mrb[64].mxu1 %vm5563_vm15, %v3679_v45 }
0x1a38   :  { %4173 = vmatprep.mubr.msk.f32.mxu1 %vm4352_vm0, %v4353_v6 }
0x1a3b   :  { %4174 = vmatmul.mubr.msk.f32.gmra.mrb[66].mxu1 %vm5564_vm5, %v3680_v63 }
0x1a3c   :  { %4176 = vmatprep.mubr.msk.f32.mxu1 %vm4352_vm0, %v4353_v6 }
0x1a3f   :  { %4177 = vmatmul.mubr.msk.f32.gmra.mrb[68].mxu1 %vm5565_vm7, %v3681_v34 }
0x1a40   :  { %4179 = vmatprep.mubr.msk.f32.mxu1 %vm4352_vm0, %v4353_v6 }
0x1a43   :  { %4180 = vmatmul.mubr.msk.f32.gmra.mrb[70].mxu1 %vm5566_vm8, %v3682_v52 }
0x1a44   :  { %4182 = vmatprep.mubr.msk.f32.mxu1 %vm4352_vm0, %v4353_v6  ;;  %vm3486_vm0 = vcmp.gt.f32.partialorder %v3477_v44, 0.0 }
0x1a47   :  { %4183 = vmatmul.mubr.msk.f32.gmra.mrb[72].mxu1 %vm5567_vm1, %v3683_v42 }
0x1a74   :  { %v3474_v33 = vpop.xlane.xlu1 %3473 }
0x1a75   :  { %vm3485_vm10 = vcmp.gt.f32.partialorder %v3474_v33, 0.0 }
0x1a78   :  { %v3483_v30 = vpop.xlane.xlu1 %3482 }
0x1a79   :  { %vm3488_vm12 = vcmp.gt.f32.partialorder %v3483_v30, 0.0 }
0x1b0a   :  { %v3445_v21 = vpop.f32.mrb[64].mxu1 }
0x1b0b   :  { %v3499_v24 = vsel %vm3484_vm9, %v3445_v21, %v5359_v50  ;;  %v4172_v31 = vpop.f32.mrb[65].mxu1 }
0x1b0c   :  { %3504 = vst.msk [vmem:[%s5545_s13] sm:$0xff] %vm415_vm4, %v3499_v24 }
0x1b0e   :  { %v3450_v43 = vpop.f32.mrb[66].mxu1 }
0x1b0f   :  { %v3500_v19 = vsel %vm3485_vm10, %v3450_v43, %v5362_v7  ;;  %v4175_v6 = vpop.f32.mrb[67].mxu1 }
0x1b10   :  { %3505 = vst.msk [vmem:[%s5545_s13 + $0x8] sm:$0xff] %vm415_vm4, %v3500_v19 }
0x1b12   :  { %v3455_v50 = vpop.f32.mrb[68].mxu1 }
0x1b13   :  { %v3501_v26 = vsel %vm3486_vm0, %v3455_v50, %v5368_v56  ;;  %v4178_v48 = vpop.f32.mrb[69].mxu1 }
0x1b14   :  { %3506 = vst.msk [vmem:[%s5545_s13 + $0x10] sm:$0xff] %vm415_vm4, %v3501_v26 }
0x1b16   :  { %v3460_v7 = vpop.f32.mrb[70].mxu1 }
0x1b17   :  { %v3502_v60 = vsel %vm3487_vm11, %v3460_v7, %v5371_v28  ;;  %v4181_v10 = vpop.f32.mrb[71].mxu1 }
0x1b18   :  { %3507 = vst.msk [vmem:[%s5545_s13 + $0x18] sm:$0xff] %vm415_vm4, %v3502_v60 }
0x1b1a   :  { %v3465_v14 = vpop.f32.mrb[72].mxu1 }
0x1b1b   :  { %v3503_v56 = vsel %vm3488_vm12, %v3465_v14, %v5384_v51  ;;  %v4184_v57 = vpop.f32.mrb[73].mxu1 }
0x1b1c   :  { %3508 = vst.msk [vmem:[%s5545_s13 + $0x20] sm:$0xff] %vm415_vm4, %v3503_v56 }

</bundles_post_ra>
